<compile_context>
chip_gen: v6e
topology: v6e:2x2x1
jax: 0.10.0
libtpu: 0.0.40
codegen_flags: <defaults>
</compile_context>

<pallas_src>
import jax
import jax.numpy as jnp
from jax.experimental import pallas as pl
from jax.experimental.pallas import tpu as pltpu

IMG_SHAPE = (28, 28)
HIDDEN = 512
OUT_DIM = IMG_SHAPE[0] * IMG_SHAPE[1]  # 784


def _decoder_kernel(z_ref, w1t_ref, b1_ref, w2t_ref, b2_ref, w3t_ref, b3_ref,
                    out_ref):
    # Layer 1: Linear(latent -> 512) + LeakyReLU(0.2).
    # bf16 MXU operands, f32 accumulation; element-wise math in f32.
    z = z_ref[...].astype(jnp.bfloat16)
    h = jnp.dot(z, w1t_ref[...], preferred_element_type=jnp.float32)
    h = h + b1_ref[...]
    h = jnp.where(h > 0.0, h, 0.2 * h)

    # Layer 2: Linear(512 -> 512) with eval-mode BatchNorm1d folded into the
    # (pre-transposed) weights/bias, then LeakyReLU(0.2).
    h = jnp.dot(h.astype(jnp.bfloat16), w2t_ref[...],
                preferred_element_type=jnp.float32)
    h = h + b2_ref[...]
    h = jnp.where(h > 0.0, h, 0.2 * h)

    # Layer 3: Linear(512 -> 784) + Tanh (EUP).
    y = jnp.dot(h.astype(jnp.bfloat16), w3t_ref[...],
                preferred_element_type=jnp.float32)
    y = y + b3_ref[...]
    out_ref[...] = jnp.tanh(y).astype(out_ref.dtype)


def prepare_decoder_params(w1, b1, w2, b2, bn_gamma, bn_beta, bn_mean, bn_var,
                           w3, b3, eps=1e-5):
    """One-time parameter preparation, hoisted out of the per-call path.

    PyTorch Linear weights are [out, in]; we transpose once to [in, out] so the
    kernel issues plain `x @ Wt` MXU matmuls. Eval-mode BatchNorm1d is an exact
    per-feature affine, so it is folded into Linear2. Matmul operands go to
    bf16; biases stay f32.
    """
    scale = bn_gamma / jnp.sqrt(bn_var + eps)                        # [512]
    shift = bn_beta - bn_mean * scale                                # [512]
    w1t = jnp.transpose(w1).astype(jnp.bfloat16)                     # [latent, 512]
    w2t = (jnp.transpose(w2) * scale[None, :]).astype(jnp.bfloat16)  # [512, 512]
    w3t = jnp.transpose(w3).astype(jnp.bfloat16)                     # [512, 784]
    b1r = b1.reshape(1, -1).astype(jnp.float32)
    b2r = (b2 * scale + shift).reshape(1, -1).astype(jnp.float32)
    b3r = b3.reshape(1, -1).astype(jnp.float32)
    return (w1t, b1r, w2t, b2r, w3t, b3r)


def _round_up(x, m):
    return ((x + m - 1) // m) * m


def decoder_forward(z, params, *, block_b=256):
    """z: [B, latent] f32. Returns [B, 28, 28] f32."""
    w1t, b1r, w2t, b2r, w3t, b3r = params
    B, latent = z.shape

    # Batch tile: big (default 256) for throughput, but never larger than the
    # 8-aligned batch so small batches are not padded to a full large tile.
    bb = min(block_b, _round_up(B, 8))
    pad = (-B) % bb
    if pad:
        z = jnp.pad(z, ((0, pad), (0, 0)))
    Bp = B + pad
    grid = (Bp // bb,)

    out = pl.pallas_call(
        _decoder_kernel,
        out_shape=jax.ShapeDtypeStruct((Bp, OUT_DIM), jnp.float32),
        grid_spec=pltpu.PrefetchScalarGridSpec(
            num_scalar_prefetch=0,
            grid=grid,
            in_specs=[
                pl.BlockSpec((bb, latent), lambda i: (i, 0)),        # z tile
                pl.BlockSpec((latent, HIDDEN), lambda i: (0, 0)),    # W1t
                pl.BlockSpec((1, HIDDEN), lambda i: (0, 0)),         # b1
                pl.BlockSpec((HIDDEN, HIDDEN), lambda i: (0, 0)),    # W2t (BN folded)
                pl.BlockSpec((1, HIDDEN), lambda i: (0, 0)),         # b2 (BN folded)
                pl.BlockSpec((HIDDEN, OUT_DIM), lambda i: (0, 0)),   # W3t
                pl.BlockSpec((1, OUT_DIM), lambda i: (0, 0)),        # b3
            ],
            out_specs=pl.BlockSpec((bb, OUT_DIM), lambda i: (i, 0)),
        ),
        compiler_params=pltpu.CompilerParams(
            dimension_semantics=("parallel",)),
    )(z, w1t, b1r, w2t, b2r, w3t, b3r)

    return out[:B].reshape(B, *IMG_SHAPE)


def _reference_forward(z, w1, b1, w2, b2, bn_gamma, bn_beta, bn_mean, bn_var,
                       w3, b3, eps=1e-5):
    """Pure-JAX f32 reference matching the PyTorch module (eval-mode BN)."""
    h = z @ w1.T + b1
    h = jnp.where(h > 0.0, h, 0.2 * h)
    h = h @ w2.T + b2
    h = (h - bn_mean) / jnp.sqrt(bn_var + eps) * bn_gamma + bn_beta
    h = jnp.where(h > 0.0, h, 0.2 * h)
    y = jnp.tanh(h @ w3.T + b3)
    return y.reshape(z.shape[0], *IMG_SHAPE)


if __name__ == "__main__":
    # Small, deterministic example shapes.
    B, latent_dim = 8, 64

    key = jax.random.PRNGKey(0)
    ks = jax.random.split(key, 11)

    z = jax.random.normal(ks[0], (B, latent_dim), dtype=jnp.float32)

    def linear_init(kw, kb, out_dim, in_dim):
        bound = 1.0 / (in_dim ** 0.5)
        w = jax.random.uniform(kw, (out_dim, in_dim), jnp.float32, -bound, bound)
        b = jax.random.uniform(kb, (out_dim,), jnp.float32, -bound, bound)
        return w, b

    w1, b1 = linear_init(ks[1], ks[2], HIDDEN, latent_dim)
    w2, b2 = linear_init(ks[3], ks[4], HIDDEN, HIDDEN)
    w3, b3 = linear_init(ks[5], ks[6], OUT_DIM, HIDDEN)

    # Non-trivial eval-mode BatchNorm1d statistics / affine parameters so the
    # BN fold is actually exercised.
    bn_gamma = jax.random.uniform(ks[7], (HIDDEN,), jnp.float32, 0.8, 1.2)
    bn_beta = 0.1 * jax.random.normal(ks[8], (HIDDEN,), dtype=jnp.float32)
    bn_mean = 0.1 * jax.random.normal(ks[9], (HIDDEN,), dtype=jnp.float32)
    bn_var = jax.random.uniform(ks[10], (HIDDEN,), jnp.float32, 0.5, 1.5)

    params = prepare_decoder_params(w1, b1, w2, b2, bn_gamma, bn_beta,
                                    bn_mean, bn_var, w3, b3)

    fwd = jax.jit(decoder_forward)
    img = jax.block_until_ready(fwd(z, params))

    ref = _reference_forward(z, w1, b1, w2, b2, bn_gamma, bn_beta, bn_mean,
                             bn_var, w3, b3)

    assert img.shape == (B, *IMG_SHAPE)
    # bf16 MXU operands (f32 accumulation) => tolerance loosened vs pure f32.
    max_err = float(jnp.max(jnp.abs(img - ref)))
    assert jnp.allclose(img, ref, atol=5e-2, rtol=5e-2), max_err

    print("KERNEL_OK")
</pallas_src>

<mosaic_0001>
module attributes {stable_mosaic.version = 11 : i64} {
  func.func @_decoder_kernel(%arg0: i32, %arg1: memref<8x64xf32, #tpu.memory_space<vmem>>, %arg2: memref<64x512xbf16, #tpu.memory_space<vmem>>, %arg3: memref<1x512xf32, #tpu.memory_space<vmem>>, %arg4: memref<512x512xbf16, #tpu.memory_space<vmem>>, %arg5: memref<1x512xf32, #tpu.memory_space<vmem>>, %arg6: memref<512x784xbf16, #tpu.memory_space<vmem>>, %arg7: memref<1x784xf32, #tpu.memory_space<vmem>>, %arg8: memref<8x784xf32, #tpu.memory_space<vmem>>) attributes {dimension_semantics = [#tpu.dimension_semantics<parallel>], iteration_bounds = array<i64: 1>, scalar_prefetch = 0 : i64, scratch_operands = 0 : i64, tpu.core_type = #tpu.core_type<tc>, window_params = [{transform_indices = @transform_0, window_bounds = array<i64: 8, 64>}, {pipeline_mode = #tpu.pipeline_mode<synchronous>, transform_indices = @transform_1, window_bounds = array<i64: 64, 512>}, {pipeline_mode = #tpu.pipeline_mode<synchronous>, transform_indices = @transform_2, window_bounds = array<i64: 1, 512>}, {pipeline_mode = #tpu.pipeline_mode<synchronous>, transform_indices = @transform_3, window_bounds = array<i64: 512, 512>}, {pipeline_mode = #tpu.pipeline_mode<synchronous>, transform_indices = @transform_4, window_bounds = array<i64: 1, 512>}, {pipeline_mode = #tpu.pipeline_mode<synchronous>, transform_indices = @transform_5, window_bounds = array<i64: 512, 784>}, {pipeline_mode = #tpu.pipeline_mode<synchronous>, transform_indices = @transform_6, window_bounds = array<i64: 1, 784>}, {transform_indices = @transform_7, window_bounds = array<i64: 8, 784>}]} {
    %c0 = arith.constant 0 : index
    %c0_0 = arith.constant 0 : index
    %0 = vector.load %arg1[%c0, %c0_0] : memref<8x64xf32, #tpu.memory_space<vmem>>, vector<8x64xf32>
    %1 = arith.truncf %0 : vector<8x64xf32> to vector<8x64xbf16>
    %c0_1 = arith.constant 0 : index
    %c0_2 = arith.constant 0 : index
    %2 = vector.load %arg2[%c0_1, %c0_2] : memref<64x512xbf16, #tpu.memory_space<vmem>>, vector<64x512xbf16>
    %cst = arith.constant dense<0.000000e+00> : vector<8x512xf32>
    %3 = tpu.matmul %1, %2, %cst {dimension_numbers = #tpu.dot_dimension_numbers<[1], [0], [0], [1], [0, 0, 1, 1], [], []>} : vector<8x64xbf16>, vector<64x512xbf16>, vector<8x512xf32> -> vector<8x512xf32>
    %c0_3 = arith.constant 0 : index
    %c0_4 = arith.constant 0 : index
    %4 = vector.load %arg3[%c0_3, %c0_4] : memref<1x512xf32, #tpu.memory_space<vmem>>, vector<1x512xf32>
    %5 = vector.broadcast %4 : vector<1x512xf32> to vector<8x512xf32>
    %6 = arith.addf %3, %5 : vector<8x512xf32>
    %cst_5 = arith.constant 0.000000e+00 : f32
    %7 = vector.broadcast %cst_5 : f32 to vector<8x512xf32>
    %8 = arith.cmpf ogt, %6, %7 : vector<8x512xf32>
    %cst_6 = arith.constant 2.000000e-01 : f32
    %9 = vector.broadcast %cst_6 : f32 to vector<8x512xf32>
    %10 = arith.mulf %9, %6 : vector<8x512xf32>
    %11 = arith.select %8, %6, %10 : vector<8x512xi1>, vector<8x512xf32>
    %12 = arith.truncf %11 : vector<8x512xf32> to vector<8x512xbf16>
    %c0_7 = arith.constant 0 : index
    %c0_8 = arith.constant 0 : index
    %13 = vector.load %arg4[%c0_7, %c0_8] : memref<512x512xbf16, #tpu.memory_space<vmem>>, vector<512x512xbf16>
    %cst_9 = arith.constant dense<0.000000e+00> : vector<8x512xf32>
    %14 = tpu.matmul %12, %13, %cst_9 {dimension_numbers = #tpu.dot_dimension_numbers<[1], [0], [0], [1], [0, 0, 1, 1], [], []>} : vector<8x512xbf16>, vector<512x512xbf16>, vector<8x512xf32> -> vector<8x512xf32>
    %c0_10 = arith.constant 0 : index
    %c0_11 = arith.constant 0 : index
    %15 = vector.load %arg5[%c0_10, %c0_11] : memref<1x512xf32, #tpu.memory_space<vmem>>, vector<1x512xf32>
    %16 = vector.broadcast %15 : vector<1x512xf32> to vector<8x512xf32>
    %17 = arith.addf %14, %16 : vector<8x512xf32>
    %cst_12 = arith.constant 0.000000e+00 : f32
    %18 = vector.broadcast %cst_12 : f32 to vector<8x512xf32>
    %19 = arith.cmpf ogt, %17, %18 : vector<8x512xf32>
    %cst_13 = arith.constant 2.000000e-01 : f32
    %20 = vector.broadcast %cst_13 : f32 to vector<8x512xf32>
    %21 = arith.mulf %20, %17 : vector<8x512xf32>
    %22 = arith.select %19, %17, %21 : vector<8x512xi1>, vector<8x512xf32>
    %23 = arith.truncf %22 : vector<8x512xf32> to vector<8x512xbf16>
    %c0_14 = arith.constant 0 : index
    %c0_15 = arith.constant 0 : index
    %24 = vector.load %arg6[%c0_14, %c0_15] : memref<512x784xbf16, #tpu.memory_space<vmem>>, vector<512x784xbf16>
    %cst_16 = arith.constant dense<0.000000e+00> : vector<8x784xf32>
    %25 = tpu.matmul %23, %24, %cst_16 {dimension_numbers = #tpu.dot_dimension_numbers<[1], [0], [0], [1], [0, 0, 1, 1], [], []>} : vector<8x512xbf16>, vector<512x784xbf16>, vector<8x784xf32> -> vector<8x784xf32>
    %c0_17 = arith.constant 0 : index
    %c0_18 = arith.constant 0 : index
    %26 = vector.load %arg7[%c0_17, %c0_18] : memref<1x784xf32, #tpu.memory_space<vmem>>, vector<1x784xf32>
    %27 = vector.broadcast %26 : vector<1x784xf32> to vector<8x784xf32>
    %28 = arith.addf %25, %27 : vector<8x784xf32>
    %29 = math.tanh %28 : vector<8x784xf32>
    %c0_19 = arith.constant 0 : index
    %c0_20 = arith.constant 0 : index
    %30 = vector.load %arg8[%c0_19, %c0_20] : memref<8x784xf32, #tpu.memory_space<vmem>>, vector<8x784xf32>
    tpu.vector_store %arg8[%c0_19, %c0_20], %29 {strides = array<i32>} : memref<8x784xf32, #tpu.memory_space<vmem>>, vector<8x784xf32>,
    return
  }
  func.func @transform_0(%arg0: i32) -> (i32, i32) {
    %c0_i32 = arith.constant 0 : i32
    %c0_i32_0 = arith.constant 0 : i32
    return %arg0, %c0_i32 : i32, i32
  }
  func.func @transform_1(%arg0: i32) -> (i32, i32) {
    %c0_i32 = arith.constant 0 : i32
    %c0_i32_0 = arith.constant 0 : i32
    %c0_i32_1 = arith.constant 0 : i32
    return %c0_i32, %c0_i32_0 : i32, i32
  }
  func.func @transform_2(%arg0: i32) -> (i32, i32) {
    %c0_i32 = arith.constant 0 : i32
    %c0_i32_0 = arith.constant 0 : i32
    %c0_i32_1 = arith.constant 0 : i32
    return %c0_i32, %c0_i32_0 : i32, i32
  }
  func.func @transform_3(%arg0: i32) -> (i32, i32) {
    %c0_i32 = arith.constant 0 : i32
    %c0_i32_0 = arith.constant 0 : i32
    %c0_i32_1 = arith.constant 0 : i32
    return %c0_i32, %c0_i32_0 : i32, i32
  }
  func.func @transform_4(%arg0: i32) -> (i32, i32) {
    %c0_i32 = arith.constant 0 : i32
    %c0_i32_0 = arith.constant 0 : i32
    %c0_i32_1 = arith.constant 0 : i32
    return %c0_i32, %c0_i32_0 : i32, i32
  }
  func.func @transform_5(%arg0: i32) -> (i32, i32) {
    %c0_i32 = arith.constant 0 : i32
    %c0_i32_0 = arith.constant 0 : i32
    %c0_i32_1 = arith.constant 0 : i32
    return %c0_i32, %c0_i32_0 : i32, i32
  }
  func.func @transform_6(%arg0: i32) -> (i32, i32) {
    %c0_i32 = arith.constant 0 : i32
    %c0_i32_0 = arith.constant 0 : i32
    %c0_i32_1 = arith.constant 0 : i32
    return %c0_i32, %c0_i32_0 : i32, i32
  }
  func.func @transform_7(%arg0: i32) -> (i32, i32) {
    %c0_i32 = arith.constant 0 : i32
    %c0_i32_0 = arith.constant 0 : i32
    return %arg0, %c0_i32 : i32, i32
  }
}

</mosaic_0001>

<bundles_post_ra>
// kernel: decoder_forward.1
= control target key start
LH: loop header
LB: loop body
LE: loop exit
PB: predicated region body
PF: predicated region fallthrough
CT: control target
= control target key end

     0   :  { %v3974_v1 = vmov 0   ;;  %vm147_vm0 = vcmask 523264   ;;  %vm3003_vm9 = vcmask 130048   ;;  %s5228_s1 = inlined_call_operand.vmem [shape: bf16[64,512], index: 1, kind: input, shape index: {}]   ;;  %s5229_s0 = inlined_call_operand.vmem [shape: f32[8,64], index: 0, kind: input, shape index: {}]   ;;  %s5230_s3 = inlined_call_operand.vmem [shape: bf16[512,512], index: 3, kind: input, shape index: {}]   ;;  %s5231_s5 = inlined_call_operand.vmem [shape: bf16[512,784], index: 5, kind: input, shape index: {}]   ;;  %s5232_s2 = inlined_call_operand.vmem [shape: f32[1,512], index: 2, kind: input, shape index: {}]   ;;  %s5233_s4 = inlined_call_operand.vmem [shape: f32[1,512], index: 4, kind: input, shape index: {}]   ;;  %s5234_s6 = inlined_call_operand.vmem [shape: f32[1,784], index: 6, kind: input, shape index: {}]   ;;  %s5235_s7 = inlined_call_operand.vmem [shape: f32[8,784], index: 7, kind: output, shape index: {}]  }
   0x1   :  { %v3424_v0 = vld [vmem:[%s5228_s1 + $0x64] ss:$16 sps:$4 sm:$0xff]   ;;  %183 = vmatprep.mubr.bf16.mxu0 %v3974_v1  ;;  %224 = vmatprep.mubr.bf16.mxu1 %v3974_v1  ;;  %v3426_v2 = vld [vmem:[%s5228_s1 + $0x6c] ss:$16 sps:$4 sm:$0xff]   ;;  %v3428_v3 = vld [vmem:[%s5228_s1 + $0x60] ss:$16 sps:$4 sm:$0xff]  }
   0x2   :  { %159 = vmatprep.subr.bf16.mxu0 %v3424_v0  ;;  %v3429_v4 = vld [vmem:[%s5228_s1 + $0x68] ss:$16 sps:$4 sm:$0xff]   ;;  %200 = vmatprep.subr.bf16.mxu1 %v3426_v2  ;;  %v3430_v5 = vld [vmem:[%s5228_s1 + $0x44] ss:$16 sps:$4 sm:$0xff]   ;;  %v3432_v6 = vld [vmem:[%s5228_s1 + $0x4c] ss:$16 sps:$4 sm:$0xff]  }
   0x3   :  { %160 = vmatpush1.bf16.msra.mxu0 %v3428_v3  ;;  %201 = vmatpush1.bf16.msra.mxu1 %v3429_v4  ;;  %v3434_v7 = vld [vmem:[%s5228_s1 + $0x40] ss:$16 sps:$4 sm:$0xff]   ;;  %v3435_v8 = vld [vmem:[%s5228_s1 + $0x48] ss:$16 sps:$4 sm:$0xff]   ;;  %v3436_v9 = vld [vmem:[%s5228_s1 + $0x24] ss:$16 sps:$4 sm:$0xff]  }
   0x4   :  { %161 = vmatprep.subr.bf16.mxu0 %v3430_v5  ;;  %202 = vmatprep.subr.bf16.mxu1 %v3432_v6  ;;  %v3438_v10 = vld [vmem:[%s5228_s1 + $0x2c] ss:$16 sps:$4 sm:$0xff]   ;;  %v3440_v11 = vld [vmem:[%s5228_s1 + $0x20] ss:$16 sps:$4 sm:$0xff]   ;;  %v3441_v12 = vld [vmem:[%s5228_s1 + $0x28] ss:$16 sps:$4 sm:$0xff]  }
   0x5   :  { %v3442_v13 = vld [vmem:[%s5228_s1 + $0x4] ss:$16 sps:$4 sm:$0xff]   ;;  %v3444_v14 = vld [vmem:[%s5228_s1 + $0xc] ss:$16 sps:$4 sm:$0xff]   ;;  %v3446_v15 = vld [vmem:[%s5228_s1] ss:$16 sps:$4 sm:$0xff]  }
   0x6   :  { %v3447_v16 = vld [vmem:[%s5228_s1 + $0x8] ss:$16 sps:$4 sm:$0xff]   ;;  %v27_v17 = vld [vmem:[%s5229_s0] sm:$0xff] }
   0x7   :  { %162 = vmatpush1.bf16.msra.mxu0 %v3434_v7  ;;  %203 = vmatpush1.bf16.msra.mxu1 %v3435_v8  ;;  %v3450_v18 = vld [vmem:[%s5230_s3 + $0xe4] ss:$16 sps:$4 sm:$0xff]   ;;  %v28_v20 = vpack.c.bf16 %v27_v17, %v27_v17  ;;  %v3448_v21 = vld [vmem:[%s5230_s3 + $0xe0] ss:$16 sps:$4 sm:$0xff]  }
   0x8   :  { %163 = vmatprep.subr.bf16.mxu0 %v3436_v9  ;;  %204 = vmatprep.subr.bf16.mxu1 %v3438_v10  ;;  %v3453_v19 = vld [vmem:[%s5230_s3 + $0x2e4] ss:$16 sps:$4 sm:$0xff]   ;;  %v3451_v22 = vld [vmem:[%s5230_s3 + $0x2e0] ss:$16 sps:$4 sm:$0xff]  }
   0x9   :  { %v3456_v23 = vld [vmem:[%s5230_s3 + $0xc4] ss:$16 sps:$4 sm:$0xff]   ;;  %v3454_v25 = vld [vmem:[%s5230_s3 + $0xc0] ss:$16 sps:$4 sm:$0xff]  }
   0xa   :  { %v3459_v24 = vld [vmem:[%s5230_s3 + $0x2c4] ss:$16 sps:$4 sm:$0xff]   ;;  %v3457_v26 = vld [vmem:[%s5230_s3 + $0x2c0] ss:$16 sps:$4 sm:$0xff]  }
   0xb   :  { %164 = vmatpush1.bf16.msra.mxu0 %v3440_v11  ;;  %205 = vmatpush1.bf16.msra.mxu1 %v3441_v12  ;;  %v3462_v27 = vld [vmem:[%s5230_s3 + $0xa4] ss:$16 sps:$4 sm:$0xff]   ;;  %v3460_v29 = vld [vmem:[%s5230_s3 + $0xa0] ss:$16 sps:$4 sm:$0xff]  }
   0xc   :  { %165 = vmatprep.subr.bf16.mxu0 %v3442_v13  ;;  %206 = vmatprep.subr.bf16.mxu1 %v3444_v14  ;;  %v3465_v28 = vld [vmem:[%s5230_s3 + $0x2a4] ss:$16 sps:$4 sm:$0xff]   ;;  %v3463_v30 = vld [vmem:[%s5230_s3 + $0x2a0] ss:$16 sps:$4 sm:$0xff]  }
   0xd   :  { %v3468_v31 = vld [vmem:[%s5230_s3 + $0x84] ss:$16 sps:$4 sm:$0xff]   ;;  %v3466_v33 = vld [vmem:[%s5230_s3 + $0x80] ss:$16 sps:$4 sm:$0xff]  }
   0xe   :  { %v3471_v32 = vld [vmem:[%s5230_s3 + $0x284] ss:$16 sps:$4 sm:$0xff]   ;;  %v3469_v34 = vld [vmem:[%s5230_s3 + $0x280] ss:$16 sps:$4 sm:$0xff]  }
   0xf   :  { %166 = vmatpush1.bf16.msra.mxu0 %v3446_v15  ;;  %207 = vmatpush1.bf16.msra.mxu1 %v3447_v16  ;;  %v3474_v35 = vld [vmem:[%s5230_s3 + $0x64] ss:$16 sps:$4 sm:$0xff]   ;;  %v3472_v37 = vld [vmem:[%s5230_s3 + $0x60] ss:$16 sps:$4 sm:$0xff]  }
  0x10   :  { %1039 = vmatprep.subr.bf16.mxu0 %v3450_v18  ;;  %1080 = vmatprep.subr.bf16.mxu1 %v3453_v19  ;;  %v3477_v36 = vld [vmem:[%s5230_s3 + $0x264] ss:$16 sps:$4 sm:$0xff]   ;;  %v3475_v38 = vld [vmem:[%s5230_s3 + $0x260] ss:$16 sps:$4 sm:$0xff]   ;;  %v3546_v19 = vld [vmem:[%s5230_s3 + $0xec] ss:$16 sps:$4 sm:$0xff]  }
  0x11   :  { %v3480_v39 = vld [vmem:[%s5230_s3 + $0x44] ss:$16 sps:$4 sm:$0xff]   ;;  %v3478_v41 = vld [vmem:[%s5230_s3 + $0x40] ss:$16 sps:$4 sm:$0xff]  }
  0x12   :  { %3025 = vmatmul.mubr.msk.bf16.vlgmr.msra.gmra.mxu0 %vm147_vm0, %v28_v20  ;;  %3026 = vmatmul.mubr.msk.bf16.vlgmr.msra.gmra.mxu1 %vm147_vm0, %v28_v20  ;;  %v3483_v40 = vld [vmem:[%s5230_s3 + $0x244] ss:$16 sps:$4 sm:$0xff]   ;;  %v3481_v42 = vld [vmem:[%s5230_s3 + $0x240] ss:$16 sps:$4 sm:$0xff]   ;;  %v3549_v20 = vld [vmem:[%s5230_s3 + $0x2ec] ss:$16 sps:$4 sm:$0xff]  }
  0x13   :  { %1040 = vmatpush1.bf16.msra.mxu0 %v3448_v21  ;;  %1081 = vmatpush1.bf16.msra.mxu1 %v3451_v22  ;;  %v3486_v43 = vld [vmem:[%s5230_s3 + $0x24] ss:$16 sps:$4 sm:$0xff]   ;;  %v3484_v45 = vld [vmem:[%s5230_s3 + $0x20] ss:$16 sps:$4 sm:$0xff]   ;;  %v47_v21 = vlaneseq }
  0x14   :  { %1041 = vmatprep.subr.bf16.mxu0 %v3456_v23  ;;  %1082 = vmatprep.subr.bf16.mxu1 %v3459_v24  ;;  %v3489_v44 = vld [vmem:[%s5230_s3 + $0x224] ss:$16 sps:$4 sm:$0xff]   ;;  %v3487_v46 = vld [vmem:[%s5230_s3 + $0x220] ss:$16 sps:$4 sm:$0xff]  }
  0x15   :  { %v3492_v47 = vld [vmem:[%s5230_s3 + $0x4] ss:$16 sps:$4 sm:$0xff]   ;;  %v3490_v49 = vld [vmem:[%s5230_s3] ss:$16 sps:$4 sm:$0xff]   ;;  %v4264_v22 = vshrl.u32 %v47_v21, 7 }
  0x16   :  { %v3495_v48 = vld [vmem:[%s5230_s3 + $0x204] ss:$16 sps:$4 sm:$0xff]   ;;  %v3493_v50 = vld [vmem:[%s5230_s3 + $0x200] ss:$16 sps:$4 sm:$0xff]   ;;  %v3589_v21 = vld [vmem:[%s5230_s3 + $0x208] ss:$16 sps:$4 sm:$0xff]  }
  0x17   :  { %1042 = vmatpush1.bf16.msra.mxu0 %v3454_v25  ;;  %1083 = vmatpush1.bf16.msra.mxu1 %v3457_v26  ;;  %v3498_v51 = vld [vmem:[%s5230_s3 + $0x1e4] ss:$16 sps:$4 sm:$0xff]   ;;  %v3496_v53 = vld [vmem:[%s5230_s3 + $0x1e0] ss:$16 sps:$4 sm:$0xff]   ;;  %v4270_v24 = vsub.s32 0, %v4264_v22  ;;  %v4273_v25 = vsub.s32 2, %v4264_v22 }
  0x18   :  { %1043 = vmatprep.subr.bf16.mxu0 %v3462_v27  ;;  %1084 = vmatprep.subr.bf16.mxu1 %v3465_v28  ;;  %v3501_v52 = vld [vmem:[%s5230_s3 + $0x3e4] ss:$16 sps:$4 sm:$0xff]   ;;  %v3499_v54 = vld [vmem:[%s5230_s3 + $0x3e0] ss:$16 sps:$4 sm:$0xff]   ;;  %v4276_v26 = vsub.s32 1, %v4264_v22  ;;  %v4279_v27 = vsub.s32 3, %v4264_v22 }
  0x19   :  { %v3504_v55 = vld [vmem:[%s5230_s3 + $0x1c4] ss:$16 sps:$4 sm:$0xff]   ;;  %v3502_v57 = vld [vmem:[%s5230_s3 + $0x1c0] ss:$16 sps:$4 sm:$0xff]  }
  0x1a   :  { %v3507_v56 = vld [vmem:[%s5230_s3 + $0x3c4] ss:$16 sps:$4 sm:$0xff]   ;;  %v3505_v58 = vld [vmem:[%s5230_s3 + $0x3c0] ss:$16 sps:$4 sm:$0xff]  }
  0x1b   :  { %1044 = vmatpush1.bf16.msra.mxu0 %v3460_v29  ;;  %1085 = vmatpush1.bf16.msra.mxu1 %v3463_v30  ;;  %v3510_v59 = vld [vmem:[%s5230_s3 + $0x1a4] ss:$16 sps:$4 sm:$0xff]   ;;  %v3508_v61 = vld [vmem:[%s5230_s3 + $0x1a0] ss:$16 sps:$4 sm:$0xff]  }
  0x1c   :  { %1045 = vmatprep.subr.bf16.mxu0 %v3468_v31  ;;  %1086 = vmatprep.subr.bf16.mxu1 %v3471_v32  ;;  %v3513_v60 = vld [vmem:[%s5230_s3 + $0x3a4] ss:$16 sps:$4 sm:$0xff]   ;;  %v3511_v62 = vld [vmem:[%s5230_s3 + $0x3a0] ss:$16 sps:$4 sm:$0xff]  }
  0x1d   :  { %v3516_v63 = vld [vmem:[%s5230_s3 + $0x184] ss:$16 sps:$4 sm:$0xff]   ;;  %v3514_v1 = vld [vmem:[%s5230_s3 + $0x180] ss:$16 sps:$4 sm:$0xff]  }
  0x1e   :  { %v3519_v0 = vld [vmem:[%s5230_s3 + $0x384] ss:$16 sps:$4 sm:$0xff]   ;;  %v3517_v2 = vld [vmem:[%s5230_s3 + $0x380] ss:$16 sps:$4 sm:$0xff]  }
  0x1f   :  { %1046 = vmatpush1.bf16.msra.mxu0 %v3466_v33  ;;  %1087 = vmatpush1.bf16.msra.mxu1 %v3469_v34  ;;  %v3522_v3 = vld [vmem:[%s5230_s3 + $0x164] ss:$16 sps:$4 sm:$0xff]   ;;  %v3520_v5 = vld [vmem:[%s5230_s3 + $0x160] ss:$16 sps:$4 sm:$0xff]  }
  0x20   :  { %1047 = vmatprep.subr.bf16.mxu0 %v3474_v35  ;;  %1088 = vmatprep.subr.bf16.mxu1 %v3477_v36  ;;  %v3525_v4 = vld [vmem:[%s5230_s3 + $0x364] ss:$16 sps:$4 sm:$0xff]   ;;  %v3523_v6 = vld [vmem:[%s5230_s3 + $0x360] ss:$16 sps:$4 sm:$0xff]  }
  0x21   :  { %v3528_v7 = vld [vmem:[%s5230_s3 + $0x144] ss:$16 sps:$4 sm:$0xff]   ;;  %v3526_v9 = vld [vmem:[%s5230_s3 + $0x140] ss:$16 sps:$4 sm:$0xff]  }
  0x22   :  { %v3531_v8 = vld [vmem:[%s5230_s3 + $0x344] ss:$16 sps:$4 sm:$0xff]   ;;  %v3529_v10 = vld [vmem:[%s5230_s3 + $0x340] ss:$16 sps:$4 sm:$0xff]  }
  0x23   :  { %1048 = vmatpush1.bf16.msra.mxu0 %v3472_v37  ;;  %1089 = vmatpush1.bf16.msra.mxu1 %v3475_v38  ;;  %v3534_v11 = vld [vmem:[%s5230_s3 + $0x124] ss:$16 sps:$4 sm:$0xff]   ;;  %v3532_v13 = vld [vmem:[%s5230_s3 + $0x120] ss:$16 sps:$4 sm:$0xff]  }
  0x24   :  { %1049 = vmatprep.subr.bf16.mxu0 %v3480_v39  ;;  %1090 = vmatprep.subr.bf16.mxu1 %v3483_v40  ;;  %v3537_v12 = vld [vmem:[%s5230_s3 + $0x324] ss:$16 sps:$4 sm:$0xff]   ;;  %v3535_v14 = vld [vmem:[%s5230_s3 + $0x320] ss:$16 sps:$4 sm:$0xff]  }
  0x25   :  { %v3540_v15 = vld [vmem:[%s5230_s3 + $0x104] ss:$16 sps:$4 sm:$0xff]   ;;  %v3538_v17 = vld [vmem:[%s5230_s3 + $0x100] ss:$16 sps:$4 sm:$0xff]  }
  0x26   :  { %v3543_v16 = vld [vmem:[%s5230_s3 + $0x304] ss:$16 sps:$4 sm:$0xff]   ;;  %v3541_v18 = vld [vmem:[%s5230_s3 + $0x300] ss:$16 sps:$4 sm:$0xff]  }
  0x27   :  { %1050 = vmatpush1.bf16.msra.mxu0 %v3478_v41  ;;  %1091 = vmatpush1.bf16.msra.mxu1 %v3481_v42  ;;  %v45_v23 = vld [vmem:[%s5232_s2] sm:$0xf] }
  0x28   :  { %1051 = vmatprep.subr.bf16.mxu0 %v3486_v43  ;;  %1092 = vmatprep.subr.bf16.mxu1 %v3489_v44  ;;  %v50_v28 = vrot.slane %v45_v23, %v4270_v24  ;;  %v58_v29 = vrot.slane %v45_v23, %v4273_v25  ;;  %v54_v32 = vrot.slane %v45_v23, %v4276_v26 }
  0x29   :  { %v62_v33 = vrot.slane %v45_v23, %v4279_v27  ;;  %v3594_v23 = vld [vmem:[%s5230_s3 + $0x1ec] ss:$16 sps:$4 sm:$0xff]  }
  0x2b   :  { %1052 = vmatpush1.bf16.msra.mxu0 %v3484_v45  ;;  %1093 = vmatpush1.bf16.msra.mxu1 %v3487_v46 }
  0x2c   :  { %1053 = vmatprep.subr.bf16.mxu0 %v3492_v47  ;;  %1094 = vmatprep.subr.bf16.mxu1 %v3495_v48 }
  0x2f   :  { %1054 = vmatpush1.bf16.msra.mxu0 %v3490_v49  ;;  %1095 = vmatpush1.bf16.msra.mxu1 %v3493_v50  ;;  %v3544_v49 = vld [vmem:[%s5230_s3 + $0xe8] ss:$16 sps:$4 sm:$0xff]  }
  0x30   :  { %1055 = vmatprep.subr.bf16.mxu0 %v3498_v51  ;;  %1096 = vmatprep.subr.bf16.mxu1 %v3501_v52  ;;  %v3547_v52 = vld [vmem:[%s5230_s3 + $0x2e8] ss:$16 sps:$4 sm:$0xff]  }
  0x33   :  { %1056 = vmatpush2.bf16.msra.mxu0 %v3496_v53  ;;  %1097 = vmatpush2.bf16.msra.mxu1 %v3499_v54 }
  0x34   :  { %1057 = vmatprep.subr.bf16.mxu0 %v3504_v55  ;;  %1098 = vmatprep.subr.bf16.mxu1 %v3507_v56  ;;  %v3552_v55 = vld [vmem:[%s5230_s3 + $0xcc] ss:$16 sps:$4 sm:$0xff]  }
  0x37   :  { %1058 = vmatpush2.bf16.msra.mxu0 %v3502_v57  ;;  %1099 = vmatpush2.bf16.msra.mxu1 %v3505_v58  ;;  %v3555_v58 = vld [vmem:[%s5230_s3 + $0x2cc] ss:$16 sps:$4 sm:$0xff]  }
  0x38   :  { %1059 = vmatprep.subr.bf16.mxu0 %v3510_v59  ;;  %1100 = vmatprep.subr.bf16.mxu1 %v3513_v60  ;;  %v3550_v60 = vld [vmem:[%s5230_s3 + $0xc8] ss:$16 sps:$4 sm:$0xff]  }
  0x3b   :  { %1060 = vmatpush2.bf16.msra.mxu0 %v3508_v61  ;;  %1101 = vmatpush2.bf16.msra.mxu1 %v3511_v62  ;;  %v3553_v61 = vld [vmem:[%s5230_s3 + $0x2c8] ss:$16 sps:$4 sm:$0xff]   ;;  %v3558_v62 = vld [vmem:[%s5230_s3 + $0xac] ss:$16 sps:$4 sm:$0xff]  }
  0x3c   :  { %1061 = vmatprep.subr.bf16.mxu0 %v3516_v63  ;;  %1102 = vmatprep.subr.bf16.mxu1 %v3519_v0  ;;  %v3561_v63 = vld [vmem:[%s5230_s3 + $0x2ac] ss:$16 sps:$4 sm:$0xff]   ;;  %v3556_v0 = vld [vmem:[%s5230_s3 + $0xa8] ss:$16 sps:$4 sm:$0xff]  }
  0x3f   :  { %1062 = vmatpush2.bf16.msra.mxu0 %v3514_v1  ;;  %1103 = vmatpush2.bf16.msra.mxu1 %v3517_v2  ;;  %v3559_v1 = vld [vmem:[%s5230_s3 + $0x2a8] ss:$16 sps:$4 sm:$0xff]   ;;  %v3564_v2 = vld [vmem:[%s5230_s3 + $0x8c] ss:$16 sps:$4 sm:$0xff]  }
  0x40   :  { %1063 = vmatprep.subr.bf16.mxu0 %v3522_v3  ;;  %1104 = vmatprep.subr.bf16.mxu1 %v3525_v4  ;;  %v3567_v3 = vld [vmem:[%s5230_s3 + $0x28c] ss:$16 sps:$4 sm:$0xff]   ;;  %v3562_v4 = vld [vmem:[%s5230_s3 + $0x88] ss:$16 sps:$4 sm:$0xff]  }
  0x43   :  { %1064 = vmatpush2.bf16.msra.mxu0 %v3520_v5  ;;  %1105 = vmatpush2.bf16.msra.mxu1 %v3523_v6  ;;  %v3565_v5 = vld [vmem:[%s5230_s3 + $0x288] ss:$16 sps:$4 sm:$0xff]   ;;  %v3570_v6 = vld [vmem:[%s5230_s3 + $0x6c] ss:$16 sps:$4 sm:$0xff]  }
  0x44   :  { %1065 = vmatprep.subr.bf16.mxu0 %v3528_v7  ;;  %1106 = vmatprep.subr.bf16.mxu1 %v3531_v8  ;;  %v3573_v7 = vld [vmem:[%s5230_s3 + $0x26c] ss:$16 sps:$4 sm:$0xff]   ;;  %v3568_v8 = vld [vmem:[%s5230_s3 + $0x68] ss:$16 sps:$4 sm:$0xff]  }
  0x47   :  { %1066 = vmatpush2.bf16.msra.mxu0 %v3526_v9  ;;  %1107 = vmatpush2.bf16.msra.mxu1 %v3529_v10  ;;  %v3571_v9 = vld [vmem:[%s5230_s3 + $0x268] ss:$16 sps:$4 sm:$0xff]   ;;  %v3576_v10 = vld [vmem:[%s5230_s3 + $0x4c] ss:$16 sps:$4 sm:$0xff]  }
  0x48   :  { %1067 = vmatprep.subr.bf16.mxu0 %v3534_v11  ;;  %1108 = vmatprep.subr.bf16.mxu1 %v3537_v12  ;;  %v3579_v11 = vld [vmem:[%s5230_s3 + $0x24c] ss:$16 sps:$4 sm:$0xff]   ;;  %v3574_v12 = vld [vmem:[%s5230_s3 + $0x48] ss:$16 sps:$4 sm:$0xff]  }
  0x4b   :  { %1068 = vmatpush2.bf16.msra.mxu0 %v3532_v13  ;;  %1109 = vmatpush2.bf16.msra.mxu1 %v3535_v14  ;;  %v3577_v13 = vld [vmem:[%s5230_s3 + $0x248] ss:$16 sps:$4 sm:$0xff]   ;;  %v3582_v14 = vld [vmem:[%s5230_s3 + $0x2c] ss:$16 sps:$4 sm:$0xff]  }
  0x4c   :  { %1069 = vmatprep.subr.bf16.mxu0 %v3540_v15  ;;  %1110 = vmatprep.subr.bf16.mxu1 %v3543_v16  ;;  %v3585_v15 = vld [vmem:[%s5230_s3 + $0x22c] ss:$16 sps:$4 sm:$0xff]   ;;  %v3580_v16 = vld [vmem:[%s5230_s3 + $0x28] ss:$16 sps:$4 sm:$0xff]  }
  0x4f   :  { %1070 = vmatpush2.bf16.msra.mxu0 %v3538_v17  ;;  %1111 = vmatpush2.bf16.msra.mxu1 %v3541_v18  ;;  %v3583_v17 = vld [vmem:[%s5230_s3 + $0x228] ss:$16 sps:$4 sm:$0xff]   ;;  %v3588_v18 = vld [vmem:[%s5230_s3 + $0xc] ss:$16 sps:$4 sm:$0xff]  }
  0x50   :  { %1121 = vmatprep.subr.bf16.mxu0 %v3546_v19  ;;  %1162 = vmatprep.subr.bf16.mxu1 %v3549_v20  ;;  %v3591_v19 = vld [vmem:[%s5230_s3 + $0x20c] ss:$16 sps:$4 sm:$0xff]   ;;  %v3586_v20 = vld [vmem:[%s5230_s3 + $0x8] ss:$16 sps:$4 sm:$0xff]  }
  0xd2   :  { %v185_v30 = vpop.f32.mrf.mxu0  ;;  %v226_v31 = vpop.f32.mrf.mxu1 }
  0xd3   :  { %v186_v34 = vadd.f32 %v185_v30, %v50_v28  ;;  %v227_v35 = vadd.f32 %v226_v31, %v58_v29  ;;  %v3597_v28 = vld [vmem:[%s5230_s3 + $0x3ec] ss:$16 sps:$4 sm:$0xff]   ;;  %v3592_v29 = vld [vmem:[%s5230_s3 + $0x1e8] ss:$16 sps:$4 sm:$0xff]  }
  0xd4   :  { %v187_v36 = vpop.f32.mrf.mxu0  ;;  %v228_v37 = vpop.f32.mrf.mxu1  ;;  %v3595_v30 = vld [vmem:[%s5230_s3 + $0x3e8] ss:$16 sps:$4 sm:$0xff]   ;;  %v3600_v31 = vld [vmem:[%s5230_s3 + $0x1cc] ss:$16 sps:$4 sm:$0xff]  }
  0xd5   :  { %v237_v38 = vmul.f32 0.2, %v186_v34  ;;  %vm233_vm1 = vcmp.gt.f32.partialorder %v186_v34, 0.0  ;;  %v239_v39 = vmul.f32 0.2, %v227_v35  ;;  %v188_v40 = vadd.f32 %v187_v36, %v54_v32 }
  0xd6   :  { %v229_v41 = vadd.f32 %v228_v37, %v62_v33  ;;  %v189_v42 = vpop.f32.mrf.mxu0  ;;  %v230_v43 = vpop.f32.mrf.mxu1  ;;  %vm235_vm2 = vcmp.gt.f32.partialorder %v227_v35, 0.0  ;;  %v3603_v32 = vld [vmem:[%s5230_s3 + $0x3cc] ss:$16 sps:$4 sm:$0xff]   ;;  %v3598_v33 = vld [vmem:[%s5230_s3 + $0x1c8] ss:$16 sps:$4 sm:$0xff]  }
  0xd7   :  { %vm234_vm3 = vcmp.gt.f32.partialorder %v188_v40, 0.0  ;;  %v238_v44 = vmul.f32 0.2, %v188_v40  ;;  %v241_v47 = vsel %vm233_vm1, %v186_v34, %v237_v38  ;;  %v243_v50 = vsel %vm235_vm2, %v227_v35, %v239_v39  ;;  %v3601_v34 = vld [vmem:[%s5230_s3 + $0x3c8] ss:$16 sps:$4 sm:$0xff]  }
  0xd8   :  { %v190_v45 = vpop.f32.mrf.mxu0  ;;  %v231_v46 = vpop.f32.mrf.mxu1  ;;  %vm236_vm4 = vcmp.gt.f32.partialorder %v229_v41, 0.0  ;;  %v240_v48 = vmul.f32 0.2, %v229_v41  ;;  %v4294_v56 = vpack.c.bf16 %v241_v47, %v241_v47  ;;  %v4299_v59 = vpack.c.bf16 %v243_v50, %v243_v50  ;;  %v3606_v35 = vld [vmem:[%s5230_s3 + $0x1ac] ss:$16 sps:$4 sm:$0xff]  }
  0xd9   :  { %v242_v51 = vsel %vm234_vm3, %v188_v40, %v238_v44  ;;  %v3609_v36 = vld [vmem:[%s5230_s3 + $0x3ac] ss:$16 sps:$4 sm:$0xff]   ;;  %v3604_v37 = vld [vmem:[%s5230_s3 + $0x1a8] ss:$16 sps:$4 sm:$0xff]  }
  0xda   :  { %v246_v53 = vpack.c.bf16 %v242_v51, %v242_v51  ;;  %v244_v54 = vsel %vm236_vm4, %v229_v41, %v240_v48  ;;  %v3607_v38 = vld [vmem:[%s5230_s3 + $0x3a8] ss:$16 sps:$4 sm:$0xff]   ;;  %v3612_v39 = vld [vmem:[%s5230_s3 + $0x18c] ss:$16 sps:$4 sm:$0xff]  }
  0xdb   :  { %v248_v57 = vpack.c.bf16 %v244_v54, %v244_v54  ;;  %v3615_v40 = vld [vmem:[%s5230_s3 + $0x38c] ss:$16 sps:$4 sm:$0xff]   ;;  %v3610_v41 = vld [vmem:[%s5230_s3 + $0x188] ss:$16 sps:$4 sm:$0xff]  }
  0xdc   :  { %1071 = vmatprep.mubr.bf16.mxu0 %v246_v53  ;;  %v3613_v42 = vld [vmem:[%s5230_s3 + $0x388] ss:$16 sps:$4 sm:$0xff]   ;;  %v3618_v43 = vld [vmem:[%s5230_s3 + $0x16c] ss:$16 sps:$4 sm:$0xff]  }
  0xdd   :  { %1112 = vmatprep.mubr.bf16.mxu1 %v248_v57  ;;  %1072 = vmatmul.mubr.bf16.vlgmr.msra.gmra.mxu0 %v4294_v56  ;;  %v3621_v44 = vld [vmem:[%s5230_s3 + $0x36c] ss:$16 sps:$4 sm:$0xff]   ;;  %v3616_v45 = vld [vmem:[%s5230_s3 + $0x168] ss:$16 sps:$4 sm:$0xff]  }
  0xde   :  { %1113 = vmatmul.mubr.bf16.vlgmr.msra.gmra.mxu1 %v4299_v59  ;;  %1122 = vmatpush1.bf16.msra.mxu0 %v3544_v49  ;;  %v3619_v46 = vld [vmem:[%s5230_s3 + $0x368] ss:$16 sps:$4 sm:$0xff]   ;;  %v3624_v47 = vld [vmem:[%s5230_s3 + $0x14c] ss:$16 sps:$4 sm:$0xff]  }
  0xdf   :  { %1163 = vmatpush1.bf16.msra.mxu1 %v3547_v52  ;;  %1153 = vmatprep.mubr.bf16.mxu0 %v246_v53  ;;  %v3627_v48 = vld [vmem:[%s5230_s3 + $0x34c] ss:$16 sps:$4 sm:$0xff]   ;;  %v3622_v49 = vld [vmem:[%s5230_s3 + $0x148] ss:$16 sps:$4 sm:$0xff]  }
  0xe0   :  { %1194 = vmatprep.mubr.bf16.mxu1 %v248_v57  ;;  %1123 = vmatprep.subr.bf16.mxu0 %v3552_v55  ;;  %v3625_v50 = vld [vmem:[%s5230_s3 + $0x348] ss:$16 sps:$4 sm:$0xff]   ;;  %v3630_v51 = vld [vmem:[%s5230_s3 + $0x12c] ss:$16 sps:$4 sm:$0xff]  }
  0xe1   :  { %1164 = vmatprep.subr.bf16.mxu1 %v3555_v58  ;;  %v3633_v52 = vld [vmem:[%s5230_s3 + $0x32c] ss:$16 sps:$4 sm:$0xff]   ;;  %v3628_v53 = vld [vmem:[%s5230_s3 + $0x128] ss:$16 sps:$4 sm:$0xff]  }
  0xe2   :  { %1124 = vmatpush1.bf16.msra.mxu0 %v3550_v60  ;;  %v3631_v54 = vld [vmem:[%s5230_s3 + $0x328] ss:$16 sps:$4 sm:$0xff]   ;;  %v3636_v55 = vld [vmem:[%s5230_s3 + $0x10c] ss:$16 sps:$4 sm:$0xff]  }
  0xe3   :  { %1165 = vmatpush1.bf16.msra.mxu1 %v3553_v61  ;;  %1125 = vmatprep.subr.bf16.mxu0 %v3558_v62  ;;  %v3639_v57 = vld [vmem:[%s5230_s3 + $0x30c] ss:$16 sps:$4 sm:$0xff]   ;;  %v3634_v58 = vld [vmem:[%s5230_s3 + $0x108] ss:$16 sps:$4 sm:$0xff]  }
  0xe4   :  { %1166 = vmatprep.subr.bf16.mxu1 %v3561_v63  ;;  %v3637_v60 = vld [vmem:[%s5230_s3 + $0x308] ss:$16 sps:$4 sm:$0xff]   ;;  %v3645_v63 = vld [vmem:[%s5231_s5 + $0x154] ss:$28 sps:$4 sm:$0xff]  }
  0xe5   :  { %v3642_v61 = vld [vmem:[%s5231_s5 + $0x18c] ss:$28 sps:$4 sm:$0xff]  }
  0xe6   :  { %1126 = vmatpush1.bf16.msra.mxu0 %v3556_v0  ;;  %v3640_v62 = vld [vmem:[%s5231_s5 + $0x188] ss:$28 sps:$4 sm:$0xff]   ;;  %v3643_v0 = vld [vmem:[%s5231_s5 + $0x150] ss:$28 sps:$4 sm:$0xff]  }
  0xe7   :  { %1167 = vmatpush1.bf16.msra.mxu1 %v3559_v1  ;;  %1127 = vmatprep.subr.bf16.mxu0 %v3564_v2  ;;  %v3648_v1 = vld [vmem:[%s5231_s5 + $0x11c] ss:$28 sps:$4 sm:$0xff]  }
  0xe8   :  { %1168 = vmatprep.subr.bf16.mxu1 %v3567_v3  ;;  %v3646_v2 = vld [vmem:[%s5231_s5 + $0x118] ss:$28 sps:$4 sm:$0xff]   ;;  %v3654_v3 = vld [vmem:[%s5231_s5 + $0xac] ss:$28 sps:$4 sm:$0xff]  }
  0xea   :  { %1128 = vmatpush1.bf16.msra.mxu0 %v3562_v4  ;;  %v3688_v4 = vld [vmem:[%s5231_s5 + $0x508] ss:$28 sps:$4 sm:$0xff]  }
  0xeb   :  { %1169 = vmatpush1.bf16.msra.mxu1 %v3565_v5  ;;  %1129 = vmatprep.subr.bf16.mxu0 %v3570_v6  ;;  %v3690_v5 = vld [vmem:[%s5231_s5 + $0x50c] ss:$28 sps:$4 sm:$0xff]  }
  0xec   :  { %1170 = vmatprep.subr.bf16.mxu1 %v3573_v7  ;;  %v3652_v6 = vld [vmem:[%s5231_s5 + $0xa8] ss:$28 sps:$4 sm:$0xff]   ;;  %v3657_v7 = vld [vmem:[%s5231_s5 + $0x74] ss:$28 sps:$4 sm:$0xff]  }
  0xee   :  { %1130 = vmatpush1.bf16.msra.mxu0 %v3568_v8  ;;  %v3694_v8 = vld [vmem:[%s5231_s5 + $0x4d0] ss:$28 sps:$4 sm:$0xff]  }
  0xef   :  { %1171 = vmatpush1.bf16.msra.mxu1 %v3571_v9  ;;  %1131 = vmatprep.subr.bf16.mxu0 %v3576_v10  ;;  %v3696_v9 = vld [vmem:[%s5231_s5 + $0x4d4] ss:$28 sps:$4 sm:$0xff]  }
  0xf0   :  { %1172 = vmatprep.subr.bf16.mxu1 %v3579_v11  ;;  %v3655_v10 = vld [vmem:[%s5231_s5 + $0x70] ss:$28 sps:$4 sm:$0xff]   ;;  %v3660_v11 = vld [vmem:[%s5231_s5 + $0x3c] ss:$28 sps:$4 sm:$0xff]  }
  0xf2   :  { %1132 = vmatpush1.bf16.msra.mxu0 %v3574_v12  ;;  %v3700_v12 = vld [vmem:[%s5231_s5 + $0x498] ss:$28 sps:$4 sm:$0xff]  }
  0xf3   :  { %1173 = vmatpush1.bf16.msra.mxu1 %v3577_v13  ;;  %1133 = vmatprep.subr.bf16.mxu0 %v3582_v14  ;;  %v3702_v13 = vld [vmem:[%s5231_s5 + $0x49c] ss:$28 sps:$4 sm:$0xff]  }
  0xf4   :  { %1174 = vmatprep.subr.bf16.mxu1 %v3585_v15  ;;  %v3658_v14 = vld [vmem:[%s5231_s5 + $0x38] ss:$28 sps:$4 sm:$0xff]   ;;  %v3663_v15 = vld [vmem:[%s5231_s5 + $0x4] ss:$28 sps:$4 sm:$0xff]  }
  0xf6   :  { %1134 = vmatpush1.bf16.msra.mxu0 %v3580_v16  ;;  %v3706_v16 = vld [vmem:[%s5231_s5 + $0x460] ss:$28 sps:$4 sm:$0xff]  }
  0xf7   :  { %1175 = vmatpush1.bf16.msra.mxu1 %v3583_v17  ;;  %1135 = vmatprep.subr.bf16.mxu0 %v3588_v18  ;;  %v3708_v17 = vld [vmem:[%s5231_s5 + $0x464] ss:$28 sps:$4 sm:$0xff]  }
  0xf8   :  { %1176 = vmatprep.subr.bf16.mxu1 %v3591_v19  ;;  %v3661_v18 = vld [vmem:[%s5231_s5] ss:$28 sps:$4 sm:$0xff]   ;;  %v3666_v19 = vld [vmem:[%s5231_s5 + $0x34c] ss:$28 sps:$4 sm:$0xff]  }
  0xfa   :  { %1136 = vmatpush1.bf16.msra.mxu0 %v3586_v20  ;;  %v3712_v20 = vld [vmem:[%s5231_s5 + $0x428] ss:$28 sps:$4 sm:$0xff]  }
  0xfb   :  { %1177 = vmatpush1.bf16.msra.mxu1 %v3589_v21  ;;  %1137 = vmatprep.subr.bf16.mxu0 %v3594_v23  ;;  %v3714_v21 = vld [vmem:[%s5231_s5 + $0x42c] ss:$28 sps:$4 sm:$0xff]  }
  0xfc   :  { %1178 = vmatprep.subr.bf16.mxu1 %v3597_v28  ;;  %v3664_v23 = vld [vmem:[%s5231_s5 + $0x348] ss:$28 sps:$4 sm:$0xff]   ;;  %v3669_v28 = vld [vmem:[%s5231_s5 + $0x314] ss:$28 sps:$4 sm:$0xff]  }
  0xfe   :  { %1138 = vmatpush2.bf16.msra.mxu0 %v3592_v29  ;;  %v3718_v29 = vld [vmem:[%s5231_s5 + $0x3f0] ss:$28 sps:$4 sm:$0xff]  }
  0xff   :  { %1179 = vmatpush2.bf16.msra.mxu1 %v3595_v30  ;;  %1139 = vmatprep.subr.bf16.mxu0 %v3600_v31  ;;  %v3720_v30 = vld [vmem:[%s5231_s5 + $0x3f4] ss:$28 sps:$4 sm:$0xff]  }
 0x100   :  { %1180 = vmatprep.subr.bf16.mxu1 %v3603_v32  ;;  %v3667_v31 = vld [vmem:[%s5231_s5 + $0x310] ss:$28 sps:$4 sm:$0xff]   ;;  %v3672_v32 = vld [vmem:[%s5231_s5 + $0x2dc] ss:$28 sps:$4 sm:$0xff]  }
 0x102   :  { %1140 = vmatpush2.bf16.msra.mxu0 %v3598_v33  ;;  %v3724_v33 = vld [vmem:[%s5231_s5 + $0x3b8] ss:$28 sps:$4 sm:$0xff]  }
 0x103   :  { %1181 = vmatpush2.bf16.msra.mxu1 %v3601_v34  ;;  %1141 = vmatprep.subr.bf16.mxu0 %v3606_v35  ;;  %v3726_v34 = vld [vmem:[%s5231_s5 + $0x3bc] ss:$28 sps:$4 sm:$0xff]  }
 0x104   :  { %1182 = vmatprep.subr.bf16.mxu1 %v3609_v36  ;;  %v3670_v35 = vld [vmem:[%s5231_s5 + $0x2d8] ss:$28 sps:$4 sm:$0xff]   ;;  %v3675_v36 = vld [vmem:[%s5231_s5 + $0x2a4] ss:$28 sps:$4 sm:$0xff]  }
 0x106   :  { %1142 = vmatpush2.bf16.msra.mxu0 %v3604_v37  ;;  %v3730_v37 = vld [vmem:[%s5231_s5 + $0x380] ss:$28 sps:$4 sm:$0xff]  }
 0x107   :  { %1183 = vmatpush2.bf16.msra.mxu1 %v3607_v38  ;;  %1143 = vmatprep.subr.bf16.mxu0 %v3612_v39  ;;  %v3732_v38 = vld [vmem:[%s5231_s5 + $0x384] ss:$28 sps:$4 sm:$0xff]  }
 0x108   :  { %1184 = vmatprep.subr.bf16.mxu1 %v3615_v40  ;;  %v3673_v39 = vld [vmem:[%s5231_s5 + $0x2a0] ss:$28 sps:$4 sm:$0xff]   ;;  %v3678_v40 = vld [vmem:[%s5231_s5 + $0x26c] ss:$28 sps:$4 sm:$0xff]  }
 0x10a   :  { %1144 = vmatpush2.bf16.msra.mxu0 %v3610_v41  ;;  %v3736_v41 = vld [vmem:[%s5231_s5 + $0x6c8] ss:$28 sps:$4 sm:$0xff]  }
 0x10b   :  { %1185 = vmatpush2.bf16.msra.mxu1 %v3613_v42  ;;  %1145 = vmatprep.subr.bf16.mxu0 %v3618_v43  ;;  %v3738_v42 = vld [vmem:[%s5231_s5 + $0x6cc] ss:$28 sps:$4 sm:$0xff]  }
 0x10c   :  { %1186 = vmatprep.subr.bf16.mxu1 %v3621_v44  ;;  %v3676_v43 = vld [vmem:[%s5231_s5 + $0x268] ss:$28 sps:$4 sm:$0xff]   ;;  %v3681_v44 = vld [vmem:[%s5231_s5 + $0x234] ss:$28 sps:$4 sm:$0xff]  }
 0x10e   :  { %1146 = vmatpush2.bf16.msra.mxu0 %v3616_v45  ;;  %v3742_v45 = vld [vmem:[%s5231_s5 + $0x690] ss:$28 sps:$4 sm:$0xff]  }
 0x10f   :  { %1187 = vmatpush2.bf16.msra.mxu1 %v3619_v46  ;;  %1147 = vmatprep.subr.bf16.mxu0 %v3624_v47  ;;  %v3744_v46 = vld [vmem:[%s5231_s5 + $0x694] ss:$28 sps:$4 sm:$0xff]  }
 0x110   :  { %1188 = vmatprep.subr.bf16.mxu1 %v3627_v48  ;;  %v3679_v47 = vld [vmem:[%s5231_s5 + $0x230] ss:$28 sps:$4 sm:$0xff]   ;;  %v3684_v48 = vld [vmem:[%s5231_s5 + $0x1fc] ss:$28 sps:$4 sm:$0xff]  }
 0x112   :  { %1148 = vmatpush2.bf16.msra.mxu0 %v3622_v49  ;;  %v3748_v49 = vld [vmem:[%s5231_s5 + $0x658] ss:$28 sps:$4 sm:$0xff]  }
 0x113   :  { %1189 = vmatpush2.bf16.msra.mxu1 %v3625_v50  ;;  %1149 = vmatprep.subr.bf16.mxu0 %v3630_v51  ;;  %v3750_v50 = vld [vmem:[%s5231_s5 + $0x65c] ss:$28 sps:$4 sm:$0xff]  }
 0x114   :  { %1190 = vmatprep.subr.bf16.mxu1 %v3633_v52  ;;  %v3682_v51 = vld [vmem:[%s5231_s5 + $0x1f8] ss:$28 sps:$4 sm:$0xff]   ;;  %v3687_v52 = vld [vmem:[%s5231_s5 + $0x1c4] ss:$28 sps:$4 sm:$0xff]  }
 0x116   :  { %1150 = vmatpush2.bf16.msra.mxu0 %v3628_v53  ;;  %v3754_v53 = vld [vmem:[%s5231_s5 + $0x620] ss:$28 sps:$4 sm:$0xff]  }
 0x117   :  { %1191 = vmatpush2.bf16.msra.mxu1 %v3631_v54  ;;  %1151 = vmatprep.subr.bf16.mxu0 %v3636_v55  ;;  %v3756_v54 = vld [vmem:[%s5231_s5 + $0x624] ss:$28 sps:$4 sm:$0xff]  }
 0x118   :  { %1192 = vmatprep.subr.bf16.mxu1 %v3639_v57  ;;  %v3685_v55 = vld [vmem:[%s5231_s5 + $0x1c0] ss:$28 sps:$4 sm:$0xff]   ;;  %v3693_v57 = vld [vmem:[%s5231_s5 + $0x194] ss:$28 sps:$4 sm:$0xff]  }
 0x11a   :  { %1152 = vmatpush2.bf16.msra.mxu0 %v3634_v58  ;;  %v3760_v58 = vld [vmem:[%s5231_s5 + $0x5e8] ss:$28 sps:$4 sm:$0xff]  }
 0x11b   :  { %1193 = vmatpush2.bf16.msra.mxu1 %v3637_v60  ;;  %2664 = vmatprep.subr.bf16.mxu0 %v3642_v61  ;;  %v3762_v60 = vld [vmem:[%s5231_s5 + $0x5ec] ss:$28 sps:$4 sm:$0xff]   ;;  %v3768_v61 = vld [vmem:[%s5231_s5 + $0x5b4] ss:$28 sps:$4 sm:$0xff]  }
 0x11c   :  { %2705 = vmatprep.subr.bf16.mxu1 %v3690_v5 }
 0x11d   :  { %1154 = vmatmul.mubr.bf16.vlgmr.msra.gmra.mxu0 %v4294_v56  ;;  %v3651_v56 = vld [vmem:[%s5231_s5 + $0xe4] ss:$28 sps:$4 sm:$0xff]  }
 0x11e   :  { %1195 = vmatmul.mubr.bf16.vlgmr.msra.gmra.mxu1 %v4299_v59  ;;  %2665 = vmatpush1.bf16.msra.mxu0 %v3640_v62  ;;  %v3649_v59 = vld [vmem:[%s5231_s5 + $0xe0] ss:$28 sps:$4 sm:$0xff]   ;;  %v3766_v62 = vld [vmem:[%s5231_s5 + $0x5b0] ss:$28 sps:$4 sm:$0xff]  }
 0x11f   :  { %2666 = vmatprep.subr.bf16.mxu0 %v3645_v63  ;;  %2706 = vmatpush1.bf16.msra.mxu1 %v3688_v4  ;;  %v3774_v63 = vld [vmem:[%s5231_s5 + $0x57c] ss:$28 sps:$4 sm:$0xff]  }
 0x120   :  { %2707 = vmatprep.subr.bf16.mxu1 %v3696_v9 }
 0x122   :  { %2667 = vmatpush1.bf16.msra.mxu0 %v3643_v0  ;;  %v3772_v0 = vld [vmem:[%s5231_s5 + $0x578] ss:$28 sps:$4 sm:$0xff]  }
 0x123   :  { %2668 = vmatprep.subr.bf16.mxu0 %v3648_v1  ;;  %2708 = vmatpush1.bf16.msra.mxu1 %v3694_v8  ;;  %v3780_v1 = vld [vmem:[%s5231_s5 + $0x544] ss:$28 sps:$4 sm:$0xff]  }
 0x124   :  { %2709 = vmatprep.subr.bf16.mxu1 %v3702_v13 }
 0x126   :  { %2669 = vmatpush1.bf16.msra.mxu0 %v3646_v2  ;;  %v3778_v2 = vld [vmem:[%s5231_s5 + $0x540] ss:$28 sps:$4 sm:$0xff]  }
 0x127   :  { %2670 = vmatprep.subr.bf16.mxu0 %v3651_v56  ;;  %2710 = vmatpush1.bf16.msra.mxu1 %v3700_v12  ;;  %v3786_v56 = vld [vmem:[%s5231_s5 + $0x514] ss:$28 sps:$4 sm:$0xff]  }
 0x128   :  { %2711 = vmatprep.subr.bf16.mxu1 %v3708_v17 }
 0x12a   :  { %2671 = vmatpush1.bf16.msra.mxu0 %v3649_v59  ;;  %v4680_v59 = vld [vmem:[%s5233_s4] sm:$0xf] }
 0x12b   :  { %2672 = vmatprep.subr.bf16.mxu0 %v3654_v3  ;;  %2712 = vmatpush1.bf16.msra.mxu1 %v3706_v16  ;;  %v382_v3 = vrot.slane %v4680_v59, %v4270_v24  ;;  %v386_v4 = vrot.slane %v4680_v59, %v4276_v26 }
 0x12c   :  { %2713 = vmatprep.subr.bf16.mxu1 %v3714_v21 }
 0x12e   :  { %2673 = vmatpush1.bf16.msra.mxu0 %v3652_v6 }
 0x12f   :  { %2674 = vmatprep.subr.bf16.mxu0 %v3657_v7  ;;  %2714 = vmatpush1.bf16.msra.mxu1 %v3712_v20 }
 0x130   :  { %2715 = vmatprep.subr.bf16.mxu1 %v3720_v30  ;;  %v3697_v30 = vld [vmem:[%s5231_s5 + $0x158] ss:$28 sps:$4 sm:$0xff]  }
 0x132   :  { %2675 = vmatpush1.bf16.msra.mxu0 %v3655_v10 }
 0x133   :  { %2676 = vmatprep.subr.bf16.mxu0 %v3660_v11  ;;  %2716 = vmatpush1.bf16.msra.mxu1 %v3718_v29  ;;  %v3699_v29 = vld [vmem:[%s5231_s5 + $0x15c] ss:$28 sps:$4 sm:$0xff]  }
 0x134   :  { %2717 = vmatprep.subr.bf16.mxu1 %v3726_v34  ;;  %v3709_v34 = vld [vmem:[%s5231_s5 + $0xe8] ss:$28 sps:$4 sm:$0xff]  }
 0x136   :  { %2677 = vmatpush1.bf16.msra.mxu0 %v3658_v14 }
 0x137   :  { %2678 = vmatprep.subr.bf16.mxu0 %v3663_v15  ;;  %2718 = vmatpush1.bf16.msra.mxu1 %v3724_v33  ;;  %v3711_v33 = vld [vmem:[%s5231_s5 + $0xec] ss:$28 sps:$4 sm:$0xff]  }
 0x138   :  { %2719 = vmatprep.subr.bf16.mxu1 %v3732_v38  ;;  %v3721_v38 = vld [vmem:[%s5231_s5 + $0x78] ss:$28 sps:$4 sm:$0xff]  }
 0x13a   :  { %2679 = vmatpush1.bf16.msra.mxu0 %v3661_v18 }
 0x13b   :  { %2680 = vmatprep.subr.bf16.mxu0 %v3666_v19  ;;  %2720 = vmatpush1.bf16.msra.mxu1 %v3730_v37  ;;  %v3723_v37 = vld [vmem:[%s5231_s5 + $0x7c] ss:$28 sps:$4 sm:$0xff]  }
 0x13c   :  { %2721 = vmatprep.subr.bf16.mxu1 %v3738_v42  ;;  %v3733_v42 = vld [vmem:[%s5231_s5 + $0x8] ss:$28 sps:$4 sm:$0xff]  }
 0x13e   :  { %2681 = vmatpush2.bf16.msra.mxu0 %v3664_v23  ;;  %v3691_v23 = vld [vmem:[%s5231_s5 + $0x190] ss:$28 sps:$4 sm:$0xff]  }
 0x13f   :  { %2682 = vmatprep.subr.bf16.mxu0 %v3669_v28  ;;  %2722 = vmatpush2.bf16.msra.mxu1 %v3736_v41  ;;  %v3735_v41 = vld [vmem:[%s5231_s5 + $0xc] ss:$28 sps:$4 sm:$0xff]  }
 0x140   :  { %2723 = vmatprep.subr.bf16.mxu1 %v3744_v46  ;;  %v3745_v46 = vld [vmem:[%s5231_s5 + $0x318] ss:$28 sps:$4 sm:$0xff]  }
 0x142   :  { %2683 = vmatpush2.bf16.msra.mxu0 %v3667_v31  ;;  %v3705_v31 = vld [vmem:[%s5231_s5 + $0x124] ss:$28 sps:$4 sm:$0xff]  }
 0x143   :  { %2684 = vmatprep.subr.bf16.mxu0 %v3672_v32  ;;  %2724 = vmatpush2.bf16.msra.mxu1 %v3742_v45  ;;  %v3703_v32 = vld [vmem:[%s5231_s5 + $0x120] ss:$28 sps:$4 sm:$0xff]  }
 0x144   :  { %2725 = vmatprep.subr.bf16.mxu1 %v3750_v50  ;;  %v3747_v45 = vld [vmem:[%s5231_s5 + $0x31c] ss:$28 sps:$4 sm:$0xff]   ;;  %v3757_v50 = vld [vmem:[%s5231_s5 + $0x2a8] ss:$28 sps:$4 sm:$0xff]  }
 0x146   :  { %2685 = vmatpush2.bf16.msra.mxu0 %v3670_v35  ;;  %v3717_v35 = vld [vmem:[%s5231_s5 + $0xb4] ss:$28 sps:$4 sm:$0xff]  }
 0x147   :  { %2686 = vmatprep.subr.bf16.mxu0 %v3675_v36  ;;  %2726 = vmatpush2.bf16.msra.mxu1 %v3748_v49  ;;  %v3715_v36 = vld [vmem:[%s5231_s5 + $0xb0] ss:$28 sps:$4 sm:$0xff]  }
 0x148   :  { %2727 = vmatprep.subr.bf16.mxu1 %v3756_v54  ;;  %v3759_v49 = vld [vmem:[%s5231_s5 + $0x2ac] ss:$28 sps:$4 sm:$0xff]   ;;  %v390_v54 = vrot.slane %v4680_v59, %v4273_v25 }
 0x14a   :  { %2687 = vmatpush2.bf16.msra.mxu0 %v3673_v39  ;;  %v3729_v39 = vld [vmem:[%s5231_s5 + $0x44] ss:$28 sps:$4 sm:$0xff]  }
 0x14b   :  { %2688 = vmatprep.subr.bf16.mxu0 %v3678_v40  ;;  %2728 = vmatpush2.bf16.msra.mxu1 %v3754_v53  ;;  %v3727_v40 = vld [vmem:[%s5231_s5 + $0x40] ss:$28 sps:$4 sm:$0xff]  }
 0x14c   :  { %2729 = vmatprep.subr.bf16.mxu1 %v3762_v60  ;;  %v3771_v53 = vld [vmem:[%s5231_s5 + $0x23c] ss:$28 sps:$4 sm:$0xff]  }
 0x14e   :  { %2689 = vmatpush2.bf16.msra.mxu0 %v3676_v43  ;;  %v3741_v43 = vld [vmem:[%s5231_s5 + $0x354] ss:$28 sps:$4 sm:$0xff]  }
 0x14f   :  { %2690 = vmatprep.subr.bf16.mxu0 %v3681_v44  ;;  %2730 = vmatpush2.bf16.msra.mxu1 %v3760_v58  ;;  %v3739_v44 = vld [vmem:[%s5231_s5 + $0x350] ss:$28 sps:$4 sm:$0xff]   ;;  %v3777_v58 = vld [vmem:[%s5231_s5 + $0x204] ss:$28 sps:$4 sm:$0xff]  }
 0x150   :  { %2731 = vmatprep.subr.bf16.mxu1 %v3768_v61 }
 0x152   :  { %2691 = vmatpush2.bf16.msra.mxu0 %v3679_v47  ;;  %v3753_v47 = vld [vmem:[%s5231_s5 + $0x2e4] ss:$28 sps:$4 sm:$0xff]  }
 0x153   :  { %2692 = vmatprep.subr.bf16.mxu0 %v3684_v48  ;;  %2732 = vmatpush2.bf16.msra.mxu1 %v3766_v62  ;;  %v3751_v48 = vld [vmem:[%s5231_s5 + $0x2e0] ss:$28 sps:$4 sm:$0xff]  }
 0x154   :  { %2733 = vmatprep.subr.bf16.mxu1 %v3774_v63 }
 0x156   :  { %2693 = vmatpush2.bf16.msra.mxu0 %v3682_v51  ;;  %v3765_v51 = vld [vmem:[%s5231_s5 + $0x274] ss:$28 sps:$4 sm:$0xff]  }
 0x157   :  { %2694 = vmatprep.subr.bf16.mxu0 %v3687_v52  ;;  %2734 = vmatpush2.bf16.msra.mxu1 %v3772_v0  ;;  %v3763_v52 = vld [vmem:[%s5231_s5 + $0x270] ss:$28 sps:$4 sm:$0xff]   ;;  %v3775_v0 = vld [vmem:[%s5231_s5 + $0x200] ss:$28 sps:$4 sm:$0xff]  }
 0x158   :  { %2735 = vmatprep.subr.bf16.mxu1 %v3780_v1 }
 0x15a   :  { %2695 = vmatpush2.bf16.msra.mxu0 %v3685_v55  ;;  %v3769_v55 = vld [vmem:[%s5231_s5 + $0x238] ss:$28 sps:$4 sm:$0xff]  }
 0x15b   :  { %2746 = vmatprep.subr.bf16.mxu0 %v3693_v57  ;;  %2736 = vmatpush2.bf16.msra.mxu1 %v3778_v2  ;;  %v394_v57 = vrot.slane %v4680_v59, %v4279_v27  ;;  %v3783_v59 = vld [vmem:[%s5231_s5 + $0x1cc] ss:$28 sps:$4 sm:$0xff]  }
 0x15c   :  { %2787 = vmatprep.subr.bf16.mxu1 %v3786_v56 }
 0x19d   :  { %v1073_v5 = vpop.f32.mrf.mxu0 }
 0x19e   :  { %v1074_v6 = vadd.f32 %v1073_v5, %v382_v3  ;;  %v1114_v7 = vpop.f32.mrf.mxu1 }
 0x19f   :  { %v1075_v8 = vpop.f32.mrf.mxu0 }
 0x1a0   :  { %v1115_v9 = vadd.f32 %v1114_v7, %v1074_v6  ;;  %v1076_v10 = vadd.f32 %v1075_v8, %v386_v4  ;;  %v1116_v11 = vpop.f32.mrf.mxu1  ;;  %v3781_v8 = vld [vmem:[%s5231_s5 + $0x1c8] ss:$28 sps:$4 sm:$0xff]  }
 0x1a1   :  { %v1077_v12 = vpop.f32.mrf.mxu0 }
 0x1a2   :  { %vm1203_vm5 = vcmp.gt.f32.partialorder %v1115_v9, 0.0  ;;  %v1207_v13 = vmul.f32 0.2, %v1115_v9  ;;  %v1117_v14 = vadd.f32 %v1116_v11, %v1076_v10  ;;  %v1118_v15 = vpop.f32.mrf.mxu1  ;;  %v3789_v11 = vld [vmem:[%s5231_s5 + $0x19c] ss:$28 sps:$4 sm:$0xff]  }
 0x1a3   :  { %v1078_v16 = vpop.f32.mrf.mxu0  ;;  %v3784_v15 = vld [vmem:[%s5231_s5 + $0x510] ss:$28 sps:$4 sm:$0xff]  }
 0x1a4   :  { %vm1204_vm6 = vcmp.gt.f32.partialorder %v1117_v14, 0.0  ;;  %v1208_v17 = vmul.f32 0.2, %v1117_v14  ;;  %v1119_v18 = vpop.f32.mrf.mxu1  ;;  %v1211_v19 = vsel %vm1203_vm5, %v1115_v9, %v1207_v13 }
 0x1a5   :  { %v4691_v28 = vpack.c.bf16 %v1211_v19, %v1211_v19  ;;  %v3792_v18 = vld [vmem:[%s5231_s5 + $0x4dc] ss:$28 sps:$4 sm:$0xff]   ;;  %v3795_v19 = vld [vmem:[%s5231_s5 + $0x164] ss:$28 sps:$4 sm:$0xff]  }
 0x1a6   :  { %v1212_v20 = vsel %vm1204_vm6, %v1117_v14, %v1208_v17  ;;  %v3787_v17 = vld [vmem:[%s5231_s5 + $0x198] ss:$28 sps:$4 sm:$0xff]  }
 0x1a7   :  { %v4686_v21 = vpack.c.bf16 %v1212_v20, %v1212_v20  ;;  %v3790_v20 = vld [vmem:[%s5231_s5 + $0x4d8] ss:$28 sps:$4 sm:$0xff]  }
 0x1a9   :  { %2696 = vmatprep.mubr.bf16.mxu0 %v4686_v21 }
 0x1aa   :  { %2697 = vmatmul.mubr.bf16.vlgmr.msra.gmra.mxu0 %v4691_v28 }
 0x1ab   :  { %2747 = vmatpush1.bf16.msra.mxu0 %v3691_v23  ;;  %2778 = vmatprep.mubr.bf16.mxu0 %v4686_v21  ;;  %v3793_v23 = vld [vmem:[%s5231_s5 + $0x160] ss:$28 sps:$4 sm:$0xff]  }
 0x1ac   :  { %2748 = vmatprep.subr.bf16.mxu0 %v3699_v29  ;;  %v3798_v29 = vld [vmem:[%s5231_s5 + $0x4a4] ss:$28 sps:$4 sm:$0xff]  }
 0x1af   :  { %2749 = vmatpush1.bf16.msra.mxu0 %v3697_v30  ;;  %v3801_v30 = vld [vmem:[%s5231_s5 + $0x12c] ss:$28 sps:$4 sm:$0xff]  }
 0x1b0   :  { %2750 = vmatprep.subr.bf16.mxu0 %v3705_v31  ;;  %v3796_v31 = vld [vmem:[%s5231_s5 + $0x4a0] ss:$28 sps:$4 sm:$0xff]  }
 0x1b3   :  { %2751 = vmatpush1.bf16.msra.mxu0 %v3703_v32  ;;  %v3799_v32 = vld [vmem:[%s5231_s5 + $0x128] ss:$28 sps:$4 sm:$0xff]  }
 0x1b4   :  { %2752 = vmatprep.subr.bf16.mxu0 %v3711_v33  ;;  %v3804_v33 = vld [vmem:[%s5231_s5 + $0x46c] ss:$28 sps:$4 sm:$0xff]  }
 0x1b7   :  { %2753 = vmatpush1.bf16.msra.mxu0 %v3709_v34  ;;  %v3807_v34 = vld [vmem:[%s5231_s5 + $0xf4] ss:$28 sps:$4 sm:$0xff]  }
 0x1b8   :  { %2754 = vmatprep.subr.bf16.mxu0 %v3717_v35  ;;  %v3802_v35 = vld [vmem:[%s5231_s5 + $0x468] ss:$28 sps:$4 sm:$0xff]  }
 0x1bb   :  { %2755 = vmatpush1.bf16.msra.mxu0 %v3715_v36  ;;  %v3805_v36 = vld [vmem:[%s5231_s5 + $0xf0] ss:$28 sps:$4 sm:$0xff]  }
 0x1bc   :  { %2756 = vmatprep.subr.bf16.mxu0 %v3723_v37  ;;  %v3810_v37 = vld [vmem:[%s5231_s5 + $0x434] ss:$28 sps:$4 sm:$0xff]  }
 0x1bf   :  { %2757 = vmatpush1.bf16.msra.mxu0 %v3721_v38  ;;  %v3813_v38 = vld [vmem:[%s5231_s5 + $0xbc] ss:$28 sps:$4 sm:$0xff]  }
 0x1c0   :  { %2758 = vmatprep.subr.bf16.mxu0 %v3729_v39  ;;  %v3808_v39 = vld [vmem:[%s5231_s5 + $0x430] ss:$28 sps:$4 sm:$0xff]  }
 0x1c3   :  { %2759 = vmatpush1.bf16.msra.mxu0 %v3727_v40  ;;  %v3811_v40 = vld [vmem:[%s5231_s5 + $0xb8] ss:$28 sps:$4 sm:$0xff]  }
 0x1c4   :  { %2760 = vmatprep.subr.bf16.mxu0 %v3735_v41  ;;  %v3816_v41 = vld [vmem:[%s5231_s5 + $0x3fc] ss:$28 sps:$4 sm:$0xff]  }
 0x1c7   :  { %2761 = vmatpush1.bf16.msra.mxu0 %v3733_v42  ;;  %v3819_v42 = vld [vmem:[%s5231_s5 + $0x84] ss:$28 sps:$4 sm:$0xff]  }
 0x1c8   :  { %2762 = vmatprep.subr.bf16.mxu0 %v3741_v43  ;;  %v3814_v43 = vld [vmem:[%s5231_s5 + $0x3f8] ss:$28 sps:$4 sm:$0xff]  }
 0x1cb   :  { %2763 = vmatpush2.bf16.msra.mxu0 %v3739_v44  ;;  %v3817_v44 = vld [vmem:[%s5231_s5 + $0x80] ss:$28 sps:$4 sm:$0xff]  }
 0x1cc   :  { %2764 = vmatprep.subr.bf16.mxu0 %v3747_v45  ;;  %v3822_v45 = vld [vmem:[%s5231_s5 + $0x3c4] ss:$28 sps:$4 sm:$0xff]  }
 0x1cf   :  { %2765 = vmatpush2.bf16.msra.mxu0 %v3745_v46  ;;  %v3825_v46 = vld [vmem:[%s5231_s5 + $0x4c] ss:$28 sps:$4 sm:$0xff]  }
 0x1d0   :  { %2766 = vmatprep.subr.bf16.mxu0 %v3753_v47  ;;  %v3820_v47 = vld [vmem:[%s5231_s5 + $0x3c0] ss:$28 sps:$4 sm:$0xff]  }
 0x1d3   :  { %2767 = vmatpush2.bf16.msra.mxu0 %v3751_v48  ;;  %v3823_v48 = vld [vmem:[%s5231_s5 + $0x48] ss:$28 sps:$4 sm:$0xff]  }
 0x1d4   :  { %2768 = vmatprep.subr.bf16.mxu0 %v3759_v49  ;;  %v3828_v49 = vld [vmem:[%s5231_s5 + $0x38c] ss:$28 sps:$4 sm:$0xff]  }
 0x1d7   :  { %2769 = vmatpush2.bf16.msra.mxu0 %v3757_v50  ;;  %v3831_v50 = vld [vmem:[%s5231_s5 + $0x14] ss:$28 sps:$4 sm:$0xff]  }
 0x1d8   :  { %2770 = vmatprep.subr.bf16.mxu0 %v3765_v51  ;;  %v3826_v51 = vld [vmem:[%s5231_s5 + $0x388] ss:$28 sps:$4 sm:$0xff]  }
 0x1db   :  { %2771 = vmatpush2.bf16.msra.mxu0 %v3763_v52  ;;  %v3829_v52 = vld [vmem:[%s5231_s5 + $0x10] ss:$28 sps:$4 sm:$0xff]  }
 0x1dc   :  { %2772 = vmatprep.subr.bf16.mxu0 %v3771_v53  ;;  %v3834_v53 = vld [vmem:[%s5231_s5 + $0x6d4] ss:$28 sps:$4 sm:$0xff]  }
 0x1dd   :  { %v1155_v60 = vpop.f32.mrf.mxu0 }
 0x1de   :  { %v1156_v61 = vadd.f32 %v1155_v60, %v390_v54  ;;  %v1196_v62 = vpop.f32.mrf.mxu1  ;;  %v3837_v54 = vld [vmem:[%s5231_s5 + $0x35c] ss:$28 sps:$4 sm:$0xff]   ;;  %v3843_v60 = vld [vmem:[%s5231_s5 + $0x324] ss:$28 sps:$4 sm:$0xff]  }
 0x1df   :  { %v1157_v63 = vpop.f32.mrf.mxu0  ;;  %2773 = vmatpush2.bf16.msra.mxu0 %v3769_v55  ;;  %v3832_v55 = vld [vmem:[%s5231_s5 + $0x6d0] ss:$28 sps:$4 sm:$0xff]  }
 0x1e0   :  { %v1197_v1 = vadd.f32 %v1196_v62, %v1156_v61  ;;  %v1158_v2 = vadd.f32 %v1157_v63, %v394_v57  ;;  %v1198_v56 = vpop.f32.mrf.mxu1  ;;  %2774 = vmatprep.subr.bf16.mxu0 %v3777_v58  ;;  %v3835_v57 = vld [vmem:[%s5231_s5 + $0x358] ss:$28 sps:$4 sm:$0xff]   ;;  %v3841_v62 = vld [vmem:[%s5231_s5 + $0x320] ss:$28 sps:$4 sm:$0xff]  }
 0x1e1   :  { %v1159_v3 = vpop.f32.mrf.mxu0  ;;  %v3840_v58 = vld [vmem:[%s5231_s5 + $0x69c] ss:$28 sps:$4 sm:$0xff]   ;;  %v3846_v63 = vld [vmem:[%s5231_s5 + $0x664] ss:$28 sps:$4 sm:$0xff]  }
 0x1e2   :  { %vm1205_vm7 = vcmp.gt.f32.partialorder %v1197_v1, 0.0  ;;  %v1209_v4 = vmul.f32 0.2, %v1197_v1  ;;  %v1199_v5 = vadd.f32 %v1198_v56, %v1158_v2  ;;  %v1200_v6 = vpop.f32.mrf.mxu1  ;;  %v3838_v61 = vld [vmem:[%s5231_s5 + $0x698] ss:$28 sps:$4 sm:$0xff]  }
 0x1e3   :  { %v1160_v7 = vpop.f32.mrf.mxu0  ;;  %2775 = vmatpush2.bf16.msra.mxu0 %v3775_v0  ;;  %v3849_v0 = vld [vmem:[%s5231_s5 + $0x2ec] ss:$28 sps:$4 sm:$0xff]   ;;  %v3861_v6 = vld [vmem:[%s5231_s5 + $0x27c] ss:$28 sps:$4 sm:$0xff]  }
 0x1e4   :  { %vm1206_vm8 = vcmp.gt.f32.partialorder %v1199_v5, 0.0  ;;  %v1210_v9 = vmul.f32 0.2, %v1199_v5  ;;  %v1201_v10 = vpop.f32.mrf.mxu1  ;;  %2776 = vmatprep.subr.bf16.mxu0 %v3783_v59  ;;  %v1213_v12 = vsel %vm1205_vm7, %v1197_v1, %v1209_v4  ;;  %v3844_v1 = vld [vmem:[%s5231_s5 + $0x660] ss:$28 sps:$4 sm:$0xff]  }
 0x1e5   :  { %v4798_v16 = vpack.c.bf16 %v1213_v12, %v1213_v12  ;;  %v3847_v2 = vld [vmem:[%s5231_s5 + $0x2e8] ss:$28 sps:$4 sm:$0xff]   ;;  %v3855_v59 = vld [vmem:[%s5231_s5 + $0x2b4] ss:$28 sps:$4 sm:$0xff]   ;;  %v3865_v12 = vld [vmem:[%s5231_s5 + $0x240] ss:$28 sps:$4 sm:$0xff]  }
 0x1e6   :  { %v1214_v13 = vsel %vm1206_vm8, %v1199_v5, %v1210_v9  ;;  %v3852_v56 = vld [vmem:[%s5231_s5 + $0x62c] ss:$28 sps:$4 sm:$0xff]   ;;  %v3858_v5 = vld [vmem:[%s5231_s5 + $0x5f4] ss:$28 sps:$4 sm:$0xff]   ;;  %v3864_v9 = vld [vmem:[%s5231_s5 + $0x5bc] ss:$28 sps:$4 sm:$0xff]  }
 0x1e7   :  { %v4793_v14 = vpack.c.bf16 %v1214_v13, %v1214_v13  ;;  %2777 = vmatpush2.bf16.msra.mxu0 %v3781_v8  ;;  %v3850_v3 = vld [vmem:[%s5231_s5 + $0x628] ss:$28 sps:$4 sm:$0xff]   ;;  %v3853_v4 = vld [vmem:[%s5231_s5 + $0x2b0] ss:$28 sps:$4 sm:$0xff]   ;;  %v3859_v8 = vld [vmem:[%s5231_s5 + $0x278] ss:$28 sps:$4 sm:$0xff]  }
 0x1e8   :  { %2828 = vmatprep.subr.bf16.mxu0 %v3789_v11  ;;  %v3856_v7 = vld [vmem:[%s5231_s5 + $0x5f0] ss:$28 sps:$4 sm:$0xff]   ;;  %v3867_v10 = vld [vmem:[%s5231_s5 + $0x244] ss:$28 sps:$4 sm:$0xff]   ;;  %v3862_v11 = vld [vmem:[%s5231_s5 + $0x5b8] ss:$28 sps:$4 sm:$0xff]  }
 0x1e9   :  { %2737 = vmatprep.mubr.bf16.mxu1 %v4793_v14  ;;  %v3870_v13 = vld [vmem:[%s5231_s5 + $0x584] ss:$28 sps:$4 sm:$0xff]  }
 0x1ea   :  { %2738 = vmatmul.mubr.bf16.vlgmr.msra.gmra.mxu1 %v4798_v16  ;;  %2779 = vmatmul.mubr.bf16.vlgmr.msra.gmra.mxu0 %v4691_v28 }
 0x1eb   :  { %2788 = vmatpush1.bf16.msra.mxu1 %v3784_v15  ;;  %2819 = vmatprep.mubr.bf16.mxu1 %v4793_v14  ;;  %v3873_v15 = vld [vmem:[%s5231_s5 + $0x20c] ss:$28 sps:$4 sm:$0xff]  }
 0x1ec   :  { %2829 = vmatpush1.bf16.msra.mxu0 %v3787_v17  ;;  %2860 = vmatprep.mubr.bf16.mxu0 %v4686_v21  ;;  %v3868_v17 = vld [vmem:[%s5231_s5 + $0x580] ss:$28 sps:$4 sm:$0xff]  }
 0x1ed   :  { %2789 = vmatprep.subr.bf16.mxu1 %v3792_v18  ;;  %2830 = vmatprep.subr.bf16.mxu0 %v3795_v19  ;;  %v3871_v18 = vld [vmem:[%s5231_s5 + $0x208] ss:$28 sps:$4 sm:$0xff]  }
 0x1ee   :  { %v3876_v19 = vld [vmem:[%s5231_s5 + $0x54c] ss:$28 sps:$4 sm:$0xff]  }
 0x1ef   :  { %2790 = vmatpush1.bf16.msra.mxu1 %v3790_v20  ;;  %v3879_v20 = vld [vmem:[%s5231_s5 + $0x1d4] ss:$28 sps:$4 sm:$0xff]  }
 0x1f0   :  { %2831 = vmatpush1.bf16.msra.mxu0 %v3793_v23  ;;  %2791 = vmatprep.subr.bf16.mxu1 %v3798_v29  ;;  %v3874_v23 = vld [vmem:[%s5231_s5 + $0x548] ss:$28 sps:$4 sm:$0xff]   ;;  %v3877_v29 = vld [vmem:[%s5231_s5 + $0x1d0] ss:$28 sps:$4 sm:$0xff]  }
 0x1f1   :  { %2832 = vmatprep.subr.bf16.mxu0 %v3801_v30  ;;  %v3882_v30 = vld [vmem:[%s5231_s5 + $0x51c] ss:$28 sps:$4 sm:$0xff]  }
 0x1f3   :  { %2792 = vmatpush1.bf16.msra.mxu1 %v3796_v31  ;;  %v3883_v31 = vld [vmem:[%s5231_s5 + $0x360] ss:$28 sps:$4 sm:$0xff]  }
 0x1f4   :  { %2833 = vmatpush1.bf16.msra.mxu0 %v3799_v32  ;;  %2793 = vmatprep.subr.bf16.mxu1 %v3804_v33  ;;  %v3880_v32 = vld [vmem:[%s5231_s5 + $0x518] ss:$28 sps:$4 sm:$0xff]   ;;  %v3884_v33 = vld [vmem:[%s5231_s5 + $0x1a0] ss:$28 sps:$4 sm:$0xff]  }
 0x1f5   :  { %2834 = vmatprep.subr.bf16.mxu0 %v3807_v34  ;;  %v3887_v34 = vld [vmem:[%s5231_s5 + $0x4e4] ss:$28 sps:$4 sm:$0xff]  }
 0x1f7   :  { %2794 = vmatpush1.bf16.msra.mxu1 %v3802_v35  ;;  %v3888_v35 = vld [vmem:[%s5231_s5 + $0x328] ss:$28 sps:$4 sm:$0xff]  }
 0x1f8   :  { %2835 = vmatpush1.bf16.msra.mxu0 %v3805_v36  ;;  %2795 = vmatprep.subr.bf16.mxu1 %v3810_v37  ;;  %v3885_v36 = vld [vmem:[%s5231_s5 + $0x4e0] ss:$28 sps:$4 sm:$0xff]   ;;  %v3889_v37 = vld [vmem:[%s5231_s5 + $0x168] ss:$28 sps:$4 sm:$0xff]  }
 0x1f9   :  { %2836 = vmatprep.subr.bf16.mxu0 %v3813_v38  ;;  %v3892_v38 = vld [vmem:[%s5231_s5 + $0x4ac] ss:$28 sps:$4 sm:$0xff]  }
 0x1fb   :  { %2796 = vmatpush1.bf16.msra.mxu1 %v3808_v39  ;;  %v3893_v39 = vld [vmem:[%s5231_s5 + $0x2f0] ss:$28 sps:$4 sm:$0xff]  }
 0x1fc   :  { %2837 = vmatpush1.bf16.msra.mxu0 %v3811_v40  ;;  %2797 = vmatprep.subr.bf16.mxu1 %v3816_v41  ;;  %v3890_v40 = vld [vmem:[%s5231_s5 + $0x4a8] ss:$28 sps:$4 sm:$0xff]   ;;  %v3894_v41 = vld [vmem:[%s5231_s5 + $0x130] ss:$28 sps:$4 sm:$0xff]  }
 0x1fd   :  { %2838 = vmatprep.subr.bf16.mxu0 %v3819_v42  ;;  %v3898_v42 = vld [vmem:[%s5231_s5 + $0x2b8] ss:$28 sps:$4 sm:$0xff]  }
 0x1ff   :  { %2798 = vmatpush1.bf16.msra.mxu1 %v3814_v43  ;;  %v3895_v43 = vld [vmem:[%s5231_s5 + $0x470] ss:$28 sps:$4 sm:$0xff]  }
 0x200   :  { %2839 = vmatpush1.bf16.msra.mxu0 %v3817_v44  ;;  %2799 = vmatprep.subr.bf16.mxu1 %v3822_v45  ;;  %v3899_v44 = vld [vmem:[%s5231_s5 + $0xf8] ss:$28 sps:$4 sm:$0xff]  }
 0x201   :  { %2840 = vmatprep.subr.bf16.mxu0 %v3825_v46  ;;  %v3902_v45 = vld [vmem:[%s5231_s5 + $0x43c] ss:$28 sps:$4 sm:$0xff]  }
 0x202   :  { %v3903_v46 = vld [vmem:[%s5231_s5 + $0x280] ss:$28 sps:$4 sm:$0xff]  }
 0x203   :  { %2800 = vmatpush1.bf16.msra.mxu1 %v3820_v47  ;;  %v3900_v47 = vld [vmem:[%s5231_s5 + $0x438] ss:$28 sps:$4 sm:$0xff]  }
 0x204   :  { %2841 = vmatpush1.bf16.msra.mxu0 %v3823_v48  ;;  %2801 = vmatprep.subr.bf16.mxu1 %v3828_v49  ;;  %v3904_v48 = vld [vmem:[%s5231_s5 + $0xc0] ss:$28 sps:$4 sm:$0xff]  }
 0x205   :  { %2842 = vmatprep.subr.bf16.mxu0 %v3831_v50  ;;  %v3907_v49 = vld [vmem:[%s5231_s5 + $0x404] ss:$28 sps:$4 sm:$0xff]  }
 0x206   :  { %v3908_v50 = vld [vmem:[%s5231_s5 + $0x248] ss:$28 sps:$4 sm:$0xff]  }
 0x207   :  { %2802 = vmatpush1.bf16.msra.mxu1 %v3826_v51  ;;  %v3905_v51 = vld [vmem:[%s5231_s5 + $0x400] ss:$28 sps:$4 sm:$0xff]  }
 0x208   :  { %2843 = vmatpush1.bf16.msra.mxu0 %v3829_v52  ;;  %2803 = vmatprep.subr.bf16.mxu1 %v3834_v53  ;;  %v3909_v52 = vld [vmem:[%s5231_s5 + $0x88] ss:$28 sps:$4 sm:$0xff]  }
 0x209   :  { %2844 = vmatprep.subr.bf16.mxu0 %v3837_v54  ;;  %v3912_v53 = vld [vmem:[%s5231_s5 + $0x3cc] ss:$28 sps:$4 sm:$0xff]  }
 0x20a   :  { %v3913_v54 = vld [vmem:[%s5231_s5 + $0x210] ss:$28 sps:$4 sm:$0xff]  }
 0x20b   :  { %2804 = vmatpush2.bf16.msra.mxu1 %v3832_v55  ;;  %v3910_v55 = vld [vmem:[%s5231_s5 + $0x3c8] ss:$28 sps:$4 sm:$0xff]  }
 0x20c   :  { %2845 = vmatpush2.bf16.msra.mxu0 %v3835_v57  ;;  %2805 = vmatprep.subr.bf16.mxu1 %v3840_v58  ;;  %v3914_v57 = vld [vmem:[%s5231_s5 + $0x50] ss:$28 sps:$4 sm:$0xff]  }
 0x20d   :  { %2846 = vmatprep.subr.bf16.mxu0 %v3843_v60  ;;  %v3917_v58 = vld [vmem:[%s5231_s5 + $0x394] ss:$28 sps:$4 sm:$0xff]  }
 0x20e   :  { %v3918_v60 = vld [vmem:[%s5231_s5 + $0x1d8] ss:$28 sps:$4 sm:$0xff]  }
 0x20f   :  { %2806 = vmatpush2.bf16.msra.mxu1 %v3838_v61  ;;  %v3915_v61 = vld [vmem:[%s5231_s5 + $0x390] ss:$28 sps:$4 sm:$0xff]  }
 0x210   :  { %2847 = vmatpush2.bf16.msra.mxu0 %v3841_v62  ;;  %2807 = vmatprep.subr.bf16.mxu1 %v3846_v63  ;;  %v3919_v62 = vld [vmem:[%s5231_s5 + $0x18] ss:$28 sps:$4 sm:$0xff]  }
 0x211   :  { %2848 = vmatprep.subr.bf16.mxu0 %v3849_v0  ;;  %v3922_v63 = vld [vmem:[%s5231_s5 + $0x6dc] ss:$28 sps:$4 sm:$0xff]  }
 0x212   :  { %v3920_v0 = vld [vmem:[%s5231_s5 + $0x6d8] ss:$28 sps:$4 sm:$0xff]  }
 0x213   :  { %2808 = vmatpush2.bf16.msra.mxu1 %v3844_v1  ;;  %v3925_v1 = vld [vmem:[%s5231_s5 + $0x6a4] ss:$28 sps:$4 sm:$0xff]  }
 0x214   :  { %2849 = vmatpush2.bf16.msra.mxu0 %v3847_v2  ;;  %2809 = vmatprep.subr.bf16.mxu1 %v3852_v56  ;;  %v3923_v2 = vld [vmem:[%s5231_s5 + $0x6a0] ss:$28 sps:$4 sm:$0xff]   ;;  %v3928_v56 = vld [vmem:[%s5231_s5 + $0x66c] ss:$28 sps:$4 sm:$0xff]  }
 0x215   :  { %2850 = vmatprep.subr.bf16.mxu0 %v3855_v59  ;;  %v3926_v59 = vld [vmem:[%s5231_s5 + $0x668] ss:$28 sps:$4 sm:$0xff]  }
 0x217   :  { %2810 = vmatpush2.bf16.msra.mxu1 %v3850_v3  ;;  %v3931_v3 = vld [vmem:[%s5231_s5 + $0x634] ss:$28 sps:$4 sm:$0xff]  }
 0x218   :  { %2851 = vmatpush2.bf16.msra.mxu0 %v3853_v4  ;;  %2811 = vmatprep.subr.bf16.mxu1 %v3858_v5  ;;  %v3934_v4 = vld [vmem:[%s5231_s5 + $0x5fc] ss:$28 sps:$4 sm:$0xff]  }
 0x219   :  { %2852 = vmatprep.subr.bf16.mxu0 %v3861_v6  ;;  %v3932_v5 = vld [vmem:[%s5231_s5 + $0x5f8] ss:$28 sps:$4 sm:$0xff]   ;;  %v3937_v6 = vld [vmem:[%s5231_s5 + $0x5c4] ss:$28 sps:$4 sm:$0xff]  }
 0x21b   :  { %2812 = vmatpush2.bf16.msra.mxu1 %v3856_v7  ;;  %v3935_v7 = vld [vmem:[%s5231_s5 + $0x5c0] ss:$28 sps:$4 sm:$0xff]  }
 0x21c   :  { %2853 = vmatpush2.bf16.msra.mxu0 %v3859_v8  ;;  %2813 = vmatprep.subr.bf16.mxu1 %v3864_v9  ;;  %v3940_v8 = vld [vmem:[%s5231_s5 + $0x58c] ss:$28 sps:$4 sm:$0xff]  }
 0x21d   :  { %2854 = vmatprep.subr.bf16.mxu0 %v3867_v10  ;;  %v3938_v9 = vld [vmem:[%s5231_s5 + $0x588] ss:$28 sps:$4 sm:$0xff]   ;;  %v3943_v10 = vld [vmem:[%s5231_s5 + $0x554] ss:$28 sps:$4 sm:$0xff]  }
 0x21f   :  { %2814 = vmatpush2.bf16.msra.mxu1 %v3862_v11  ;;  %v3941_v11 = vld [vmem:[%s5231_s5 + $0x550] ss:$28 sps:$4 sm:$0xff]  }
 0x220   :  { %2855 = vmatpush2.bf16.msra.mxu0 %v3865_v12  ;;  %2815 = vmatprep.subr.bf16.mxu1 %v3870_v13  ;;  %v3944_v12 = vld [vmem:[%s5231_s5 + $0x6e0] ss:$28 sps:$4 sm:$0xff]  }
 0x221   :  { %2856 = vmatprep.subr.bf16.mxu0 %v3873_v15  ;;  %v3945_v13 = vld [vmem:[%s5231_s5 + $0x520] ss:$28 sps:$4 sm:$0xff]   ;;  %v3946_v15 = vld [vmem:[%s5231_s5 + $0x6a8] ss:$28 sps:$4 sm:$0xff]  }
 0x223   :  { %2816 = vmatpush2.bf16.msra.mxu1 %v3868_v17 }
 0x224   :  { %2857 = vmatpush2.bf16.msra.mxu0 %v3871_v18  ;;  %2817 = vmatprep.subr.bf16.mxu1 %v3876_v19  ;;  %v3947_v18 = vld [vmem:[%s5231_s5 + $0x4e8] ss:$28 sps:$4 sm:$0xff]  }
 0x225   :  { %2858 = vmatprep.subr.bf16.mxu0 %v3879_v20  ;;  %v3948_v20 = vld [vmem:[%s5231_s5 + $0x670] ss:$28 sps:$4 sm:$0xff]  }
 0x227   :  { %2818 = vmatpush2.bf16.msra.mxu1 %v3874_v23 }
 0x228   :  { %2859 = vmatpush2.bf16.msra.mxu0 %v3877_v29  ;;  %2869 = vmatprep.subr.bf16.mxu1 %v3882_v30  ;;  %v3949_v29 = vld [vmem:[%s5231_s5 + $0x4b0] ss:$28 sps:$4 sm:$0xff]  }
 0x229   :  { %3379 = vmatprep.subr.bf16.mxu0 %v3883_v31  ;;  %v3951_v31 = vld [vmem:[%s5231_s5 + $0x478] ss:$28 sps:$4 sm:$0xff]  }
 0x22a   :  { %2820 = vmatmul.mubr.bf16.vlgmr.msra.gmra.mxu1 %v4798_v16 }
 0x22b   :  { %2861 = vmatmul.mubr.bf16.vlgmr.msra.gmra.mxu0 %v4691_v28  ;;  %2870 = vmatpush1.bf16.msra.mxu1 %v3880_v32  ;;  %v3952_v32 = vld [vmem:[%s5231_s5 + $0x600] ss:$28 sps:$4 sm:$0xff]  }
 0x22c   :  { %2901 = vmatprep.mubr.bf16.mxu1 %v4793_v14  ;;  %3380 = vmatpush3.bf16.msra.mxu0 %v3884_v33  ;;  %v3953_v33 = vld [vmem:[%s5231_s5 + $0x440] ss:$28 sps:$4 sm:$0xff]  }
 0x22d   :  { %2942 = vmatprep.mubr.bf16.mxu0 %v4686_v21  ;;  %2871 = vmatprep.subr.bf16.mxu1 %v3887_v34  ;;  %v3897_v21 = vld [vmem:[%s5231_s5 + $0x474] ss:$28 sps:$4 sm:$0xff]   ;;  %v3954_v34 = vld [vmem:[%s5231_s5 + $0x5c8] ss:$28 sps:$4 sm:$0xff]  }
 0x22e   :  { %3381 = vmatprep.subr.bf16.mxu0 %v3888_v35  ;;  %v3955_v35 = vld [vmem:[%s5231_s5 + $0x408] ss:$28 sps:$4 sm:$0xff]  }
 0x22f   :  { %2872 = vmatpush1.bf16.msra.mxu1 %v3885_v36  ;;  %v3956_v36 = vld [vmem:[%s5231_s5 + $0x590] ss:$28 sps:$4 sm:$0xff]  }
 0x230   :  { %3382 = vmatpush3.bf16.msra.mxu0 %v3889_v37  ;;  %2873 = vmatprep.subr.bf16.mxu1 %v3892_v38  ;;  %v3957_v37 = vld [vmem:[%s5231_s5 + $0x3d0] ss:$28 sps:$4 sm:$0xff]   ;;  %v3958_v38 = vld [vmem:[%s5231_s5 + $0x558] ss:$28 sps:$4 sm:$0xff]  }
 0x231   :  { %3383 = vmatprep.subr.bf16.mxu0 %v3893_v39  ;;  %v3959_v39 = vld [vmem:[%s5231_s5 + $0x398] ss:$28 sps:$4 sm:$0xff]  }
 0x233   :  { %2874 = vmatpush1.bf16.msra.mxu1 %v3890_v40  ;;  %v5191_v40 = vld [vmem:[%s5234_s6] sm:$0x7f] }
 0x234   :  { %3384 = vmatpush3.bf16.msra.mxu0 %v3894_v41  ;;  %2875 = vmatprep.subr.bf16.mxu1 %v3897_v21  ;;  %v1480_v41 = vrot.slane %v5191_v40, %v4270_v24  ;;  %v1484_v21 = vrot.slane %v5191_v40, %v4276_v26  ;;  %v1488_v26 = vrot.slane %v5191_v40, %v4273_v25 }
 0x235   :  { %3385 = vmatprep.subr.bf16.mxu0 %v3898_v42 }
 0x237   :  { %2876 = vmatpush1.bf16.msra.mxu1 %v3895_v43 }
 0x238   :  { %3386 = vmatpush3.bf16.msra.mxu0 %v3899_v44  ;;  %2877 = vmatprep.subr.bf16.mxu1 %v3902_v45 }
 0x239   :  { %3387 = vmatprep.subr.bf16.mxu0 %v3903_v46 }
 0x23b   :  { %2878 = vmatpush1.bf16.msra.mxu1 %v3900_v47 }
 0x23c   :  { %3388 = vmatpush3.bf16.msra.mxu0 %v3904_v48  ;;  %2879 = vmatprep.subr.bf16.mxu1 %v3907_v49 }
 0x23d   :  { %3389 = vmatprep.subr.bf16.mxu0 %v3908_v50 }
 0x23f   :  { %2880 = vmatpush1.bf16.msra.mxu1 %v3905_v51 }
 0x240   :  { %3390 = vmatpush3.bf16.msra.mxu0 %v3909_v52  ;;  %2881 = vmatprep.subr.bf16.mxu1 %v3912_v53 }
 0x241   :  { %3391 = vmatprep.subr.bf16.mxu0 %v3913_v54  ;;  %v1492_v54 = vrot.slane %v5191_v40, %v4279_v27 }
 0x243   :  { %2882 = vmatpush1.bf16.msra.mxu1 %v3910_v55 }
 0x244   :  { %3392 = vmatpush3.bf16.msra.mxu0 %v3914_v57  ;;  %2883 = vmatprep.subr.bf16.mxu1 %v3917_v58 }
 0x245   :  { %3393 = vmatprep.subr.bf16.mxu0 %v3918_v60 }
 0x247   :  { %2884 = vmatpush1.bf16.msra.mxu1 %v3915_v61 }
 0x248   :  { %3394 = vmatpush3.bf16.msra.mxu0 %v3919_v62  ;;  %2885 = vmatprep.subr.bf16.mxu1 %v3922_v63 }
 0x24b   :  { %2886 = vmatpush2.bf16.msra.mxu1 %v3920_v0  ;;  %2943 = vmatmul.mubr.bf16.vlgmr.msra.gmra.mxu0 %v4691_v28  ;;  %v3929_v28 = vld [vmem:[%s5231_s5 + $0x630] ss:$28 sps:$4 sm:$0xff]  }
 0x24c   :  { %2887 = vmatprep.subr.bf16.mxu1 %v3925_v1 }
 0x24f   :  { %2888 = vmatpush2.bf16.msra.mxu1 %v3923_v2 }
 0x250   :  { %2889 = vmatprep.subr.bf16.mxu1 %v3928_v56 }
 0x253   :  { %2890 = vmatpush2.bf16.msra.mxu1 %v3926_v59 }
 0x254   :  { %2891 = vmatprep.subr.bf16.mxu1 %v3931_v3 }
 0x257   :  { %2892 = vmatpush2.bf16.msra.mxu1 %v3929_v28 }
 0x258   :  { %2893 = vmatprep.subr.bf16.mxu1 %v3934_v4 }
 0x25b   :  { %2894 = vmatpush2.bf16.msra.mxu1 %v3932_v5 }
 0x25c   :  { %2895 = vmatprep.subr.bf16.mxu1 %v3937_v6  ;;  %v1495_v6 = vsub.s32 4, %v4264_v22 }
 0x25f   :  { %2896 = vmatpush2.bf16.msra.mxu1 %v3935_v7  ;;  %v1499_v7 = vsub.s32 5, %v4264_v22 }
 0x260   :  { %2897 = vmatprep.subr.bf16.mxu1 %v3940_v8  ;;  %v1496_v8 = vrot.slane %v5191_v40, %v1495_v6 }
 0x263   :  { %2898 = vmatpush2.bf16.msra.mxu1 %v3938_v9  ;;  %v1500_v9 = vrot.slane %v5191_v40, %v1499_v7 }
 0x264   :  { %2899 = vmatprep.subr.bf16.mxu1 %v3943_v10 }
 0x267   :  { %2900 = vmatpush2.bf16.msra.mxu1 %v3941_v11 }
 0x268   :  { %3401 = vmatprep.subr.bf16.mxu1 %v3944_v12 }
 0x26a   :  { %2902 = vmatmul.mubr.bf16.vlgmr.msra.gmra.mxu1 %v4798_v16  ;;  %v2698_v17 = vpop.f32.mrf.mxu0 }
 0x26b   :  { %3402 = vmatpush3.bf16.msra.mxu1 %v3945_v13  ;;  %2982 = vmatprep.mubr.bf16.mxu1 %v4793_v14  ;;  %v3950_v14 = vld [vmem:[%s5231_s5 + $0x638] ss:$28 sps:$4 sm:$0xff]   ;;  %v2699_v42 = vadd.f32 %v2698_v17, %v1480_v41 }
 0x26c   :  { %v2700_v19 = vpop.f32.mrf.mxu0  ;;  %3403 = vmatprep.subr.bf16.mxu1 %v3946_v15 }
 0x26d   :  { %v2701_v45 = vadd.f32 %v2700_v19, %v1484_v21 }
 0x26e   :  { %v2702_v23 = vpop.f32.mrf.mxu0 }
 0x26f   :  { %3404 = vmatpush3.bf16.msra.mxu1 %v3947_v18 }
 0x270   :  { %v2703_v30 = vpop.f32.mrf.mxu0  ;;  %3405 = vmatprep.subr.bf16.mxu1 %v3948_v20 }
 0x273   :  { %3406 = vmatpush3.bf16.msra.mxu1 %v3949_v29  ;;  %v1503_v29 = vsub.s32 6, %v4264_v22 }
 0x274   :  { %3407 = vmatprep.subr.bf16.mxu1 %v3950_v14 }
 0x275   :  { %v1504_v30 = vrot.slane %v5191_v40, %v1503_v29 }
 0x277   :  { %3408 = vmatpush3.bf16.msra.mxu1 %v3951_v31 }
 0x278   :  { %3409 = vmatprep.subr.bf16.mxu1 %v3952_v32 }
 0x27b   :  { %3410 = vmatpush3.bf16.msra.mxu1 %v3953_v33 }
 0x27c   :  { %3411 = vmatprep.subr.bf16.mxu1 %v3954_v34 }
 0x27f   :  { %3412 = vmatpush3.bf16.msra.mxu1 %v3955_v35 }
 0x280   :  { %3413 = vmatprep.subr.bf16.mxu1 %v3956_v36 }
 0x283   :  { %3414 = vmatpush3.bf16.msra.mxu1 %v3957_v37 }
 0x284   :  { %3415 = vmatprep.subr.bf16.mxu1 %v3958_v38 }
 0x287   :  { %3416 = vmatpush3.bf16.msra.mxu1 %v3959_v39 }
 0x28a   :  { %2983 = vmatmul.mubr.bf16.vlgmr.msra.gmra.mxu1 %v4798_v16 }
 0x2aa   :  { %v2739_v43 = vpop.f32.mrf.mxu1  ;;  %v2780_v44 = vpop.f32.mrf.mxu0 }
 0x2ab   :  { %v2740_v46 = vadd.f32 %v2739_v43, %v2699_v42  ;;  %v2781_v55 = vadd.f32 %v2780_v44, %v1488_v26 }
 0x2ac   :  { %v2741_v47 = vpop.f32.mrf.mxu1  ;;  %v2782_v48 = vpop.f32.mrf.mxu0 }
 0x2ad   :  { %3960 = vtanh.f32 %v2740_v46  ;;  %v2742_v16 = vadd.f32 %v2741_v47, %v2701_v45  ;;  %v2783_v58 = vadd.f32 %v2782_v48, %v1492_v54 }
 0x2ae   :  { %v2743_v49 = vpop.f32.mrf.mxu1  ;;  %v2784_v50 = vpop.f32.mrf.mxu0 }
 0x2af   :  { %3962 = vtanh.f32 %v2742_v16 }
 0x2b0   :  { %v2744_v51 = vpop.f32.mrf.mxu1  ;;  %v2785_v52 = vpop.f32.mrf.mxu0 }
 0x2ba   :  { %v3961_v53 = vpop.eup %3960 }
 0x2bb   :  { %2997 = vst [vmem:[%s5235_s7] sm:$0xff] %v3961_v53 }
 0x2bc   :  { %v3963_v24 = vpop.eup %3962 }
 0x2bd   :  { %2998 = vst [vmem:[%s5235_s7 + $0x8] sm:$0xff] %v3963_v24 }
 0x2ea   :  { %v2821_v57 = vpop.f32.mrf.mxu1 }
 0x2eb   :  { %v2822_v60 = vadd.f32 %v2821_v57, %v2781_v55  ;;  %v2862_v61 = vpop.f32.mrf.mxu0 }
 0x2ec   :  { %v2823_v62 = vpop.f32.mrf.mxu1  ;;  %v2863_v10 = vadd.f32 %v2862_v61, %v1496_v8 }
 0x2ed   :  { %3964 = vtanh.f32 %v2822_v60  ;;  %v2824_v63 = vadd.f32 %v2823_v62, %v2783_v58  ;;  %v2864_v0 = vpop.f32.mrf.mxu0 }
 0x2ee   :  { %v2825_v1 = vpop.f32.mrf.mxu1  ;;  %v2865_v12 = vadd.f32 %v2864_v0, %v1500_v9 }
 0x2ef   :  { %3966 = vtanh.f32 %v2824_v63  ;;  %v2866_v2 = vpop.f32.mrf.mxu0 }
 0x2f0   :  { %v2826_v56 = vpop.f32.mrf.mxu1 }
 0x2f1   :  { %v2867_v59 = vpop.f32.mrf.mxu0 }
 0x2fa   :  { %v3965_v3 = vpop.eup %3964 }
 0x2fb   :  { %2999 = vst [vmem:[%s5235_s7 + $0x10] sm:$0xff] %v3965_v3 }
 0x2fc   :  { %v3967_v25 = vpop.eup %3966 }
 0x2fd   :  { %3000 = vst [vmem:[%s5235_s7 + $0x18] sm:$0xff] %v3967_v25 }
 0x30b   :  { %v3395_v27 = vpop.f32.mrf.mxu0 }
 0x30d   :  { %v3396_v28 = vpop.f32.mrf.mxu0 }
 0x30e   :  { %v3397_v14 = vadd.f32 %v3396_v28, %v3395_v27 }
 0x30f   :  { %v3398_v4 = vpop.f32.mrf.mxu0 }
 0x310   :  { %v2945_v33 = vadd.f32 %v3397_v14, %v1504_v30 }
 0x311   :  { %v3399_v5 = vpop.f32.mrf.mxu0 }
 0x32a   :  { %v2903_v11 = vpop.f32.mrf.mxu1 }
 0x32b   :  { %v2904_v13 = vadd.f32 %v2903_v11, %v2863_v10 }
 0x32c   :  { %v2905_v15 = vpop.f32.mrf.mxu1 }
 0x32d   :  { %3968 = vtanh.f32 %v2904_v13  ;;  %v2906_v17 = vadd.f32 %v2905_v15, %v2865_v12 }
 0x32e   :  { %v2907_v18 = vpop.f32.mrf.mxu1 }
 0x32f   :  { %3970 = vtanh.f32 %v2906_v17 }
 0x330   :  { %v2908_v19 = vpop.f32.mrf.mxu1 }
 0x33a   :  { %v3969_v20 = vpop.eup %3968 }
 0x33b   :  { %3001 = vst [vmem:[%s5235_s7 + $0x20] sm:$0xff] %v3969_v20 }
 0x33c   :  { %v3971_v23 = vpop.eup %3970 }
 0x33d   :  { %3002 = vst [vmem:[%s5235_s7 + $0x28] sm:$0xff] %v3971_v23 }
 0x34a   :  { %v3417_v31 = vpop.f32.mrf.mxu1 }
 0x34c   :  { %v3418_v32 = vpop.f32.mrf.mxu1 }
 0x34d   :  { %v3419_v34 = vadd.f32 %v3418_v32, %v3417_v31 }
 0x34e   :  { %v3420_v35 = vpop.f32.mrf.mxu1 }
 0x34f   :  { %v2985_v36 = vadd.f32 %v3419_v34, %v2945_v33 }
 0x350   :  { %v3421_v37 = vpop.f32.mrf.mxu1 }
 0x351   :  { %3972 = vtanh.f32 %v2985_v36 }
 0x35e   :  { %v3973_v38 = vpop.eup %3972 }
 0x35f   :  { %3004 = vst.msk [vmem:[%s5235_s7 + $0x30] sm:$0xff] %vm3003_vm9, %v3973_v38 }

</bundles_post_ra>
